<compile_context>
chip_gen: v7x
topology: tpu7x:2x2x1
jax: 0.10.0
libtpu: 0.0.40
codegen_flags: <defaults>
</compile_context>

<pallas_src>
import functools

import jax
import jax.numpy as jnp
from jax import lax
from jax.experimental import pallas as pl
from jax.experimental.pallas import tpu as pltpu

NUM_CLASSES = 4
GAMMA = 2.0                      # focal exponent
ALPHA = (0.01, 4.0, 1.8, 6.0)    # class weights for both focal CE and dice
EPS = 1e-6

# pl.reciprocal(approx=True) injects ~2^-12 relative error into the softmax
# probabilities (well inside rtol=5e-3).  Set True for tighter parity with the
# PyTorch reference at the cost of an exact divide per voxel.
PRECISE_SOFTMAX = False


def _cdiv(a, b):
    return -(-a // b)


def _default_budgets():
    """Generation-aware (max_tile_vox, vmem_limit_bytes).

    v5e/v6e have 128 MiB physical VMEM per core -> large tiles, 64 MiB limit.
    v7x has 64 MiB -> smaller tiles, 44 MiB limit (also the safe fallback).
    """
    tile_vox, vmem_limit = 256 * 1024, 44 * 1024 * 1024
    try:
        vmem = int(pltpu.get_tpu_info().vmem_capacity_bytes)
        if vmem >= 100 * 1024 * 1024:
            tile_vox, vmem_limit = 512 * 1024, 64 * 1024 * 1024
    except Exception:   # non-TPU backends / older runtimes: keep safe defaults
        pass
    return tile_vox, vmem_limit


_DEFAULT_TILE_VOX, _DEFAULT_VMEM_LIMIT = _default_budgets()


def _hybrid_stats_kernel(logits_ref, tgt_ref, stats_ref, focal_ref, *,
                         valid_vox, tile_vox, n_inner, need_mask):
    """Accumulate focal-loss sum and per-class dice statistics for one
    (batch b, split p, row-tile i) block.

    logits_ref : (C, tile_r, L)  logits for one voxel tile (any float dtype)
    tgt_ref    : (tile_r, L)     integer class ids
    stats_ref  : (C, 3)  f32     resident accumulator: [inter, pred_sum, tgt_sum]
    focal_ref  : (1, 1)  f32     resident accumulator: sum of focal terms
    """
    i = pl.program_id(2)

    @pl.when(i == 0)
    def _init():
        stats_ref[...] = jnp.zeros_like(stats_ref)
        focal_ref[...] = jnp.zeros_like(focal_ref)

    tgt = tgt_ref[...]                                        # (tile_r, L) int

    valid = None
    if need_mask:
        # Padded tail voxels must not contribute; validity is derived in-kernel
        # from the global flattened voxel index (never streamed from HBM).
        p_split = pl.program_id(1)
        rows, lanes = tgt.shape
        row = lax.broadcasted_iota(jnp.int32, (rows, lanes), 0)
        lane = lax.broadcasted_iota(jnp.int32, (rows, lanes), 1)
        idx = (p_split * n_inner + i) * tile_vox + row * lanes + lane
        valid = idx < valid_vox
        # Sentinel target: every one-hot match is false for padded voxels, so
        # the intersection / target-count sums need no extra masking.
        tgt = jnp.where(valid, tgt, -1)

    # Per-class logit planes at full vreg density; the class axis is unrolled
    # in Python so all "class reductions" are 3-deep elementwise chains.
    x = [logits_ref[c].astype(jnp.float32) for c in range(NUM_CLASSES)]

    # numerically stable softmax over the class axis
    m = jnp.maximum(jnp.maximum(x[0], x[1]), jnp.maximum(x[2], x[3]))
    z = [xc - m for xc in x]
    e = [jnp.exp(zc) for zc in z]
    s = (e[0] + e[1]) + (e[2] + e[3])
    inv_s = pl.reciprocal(s, approx=not PRECISE_SOFTMAX)
    lse = jnp.log(s)                                          # log-sum-exp of z

    eq = [tgt == c for c in range(NUM_CLASSES)]               # one-hot as bools

    # target-class shifted logit and alpha weight via select chains
    z_y = jnp.where(eq[1], z[1], z[0])
    z_y = jnp.where(eq[2], z[2], z_y)
    z_y = jnp.where(eq[3], z[3], z_y)
    a_y = jnp.where(eq[1], ALPHA[1], ALPHA[0])
    a_y = jnp.where(eq[2], ALPHA[2], a_y)
    a_y = jnp.where(eq[3], ALPHA[3], a_y)

    ce = a_y * (lse - z_y)            # weight[y] * (-log p_y), reduction='none'
    pt = jnp.exp(-ce)
    omp = 1.0 - pt
    if GAMMA == 2:
        focal_w = omp * omp
    else:
        focal_w = omp ** GAMMA
    focal = focal_w * ce

    if need_mask:
        focal = jnp.where(valid, focal, 0.0)
        inv_s = jnp.where(valid, inv_s, 0.0)    # zeroes every p_c of padded voxels

    focal_ref[...] += jnp.sum(focal)

    for c in range(NUM_CLASSES):
        pc = e[c] * inv_s                        # prob plane; dies after its sums
        stats_ref[c:c + 1, 0:1] += jnp.sum(jnp.where(eq[c], pc, 0.0))   # intersection
        if c < NUM_CLASSES - 1:
            # class-3 pred/target sums are recovered in the wrapper as
            # N_valid - sum(others): softmax rows and one-hot rows sum to 1.
            stats_ref[c:c + 1, 1:2] += jnp.sum(pc)                       # pred sum
            stats_ref[c:c + 1, 2:3] += jnp.sum(jnp.where(eq[c], 1.0, 0.0))  # target sum


def _choose_layout(dhw, max_tile_vox, row_align):
    """Pick (lane_width L, rows_per_tile, n_row_tiles, padded_dhw).

    Prefers a zero-copy layout: L | dhw and tile_r a divisor of R close to the
    VMEM budget.  If only degenerate (tiny) divisor tiles exist, or dhw is not
    a multiple of 128, fall back to a one-time HBM pad with large aligned
    tiles and an in-kernel validity mask.
    """
    if dhw % 128 == 0:
        L = max(c for c in range(128, 2049, 128) if dhw % c == 0)
        R = dhw // L
        cap = max(1, max_tile_vox // L)
        if R <= cap:
            return L, R, 1, dhw                       # whole volume in one tile
        best = 0
        t = (min(cap, R) // row_align) * row_align
        while t >= row_align:
            if R % t == 0:
                best = t
                break
            t -= row_align
        # accept only if the divisor tile is reasonably close to the budget;
        # otherwise tiny tiles make the per-grid-step overhead dominate.
        if best > 0 and (best * 2 >= min(cap, R) or best == R):
            return L, best, R // best, dhw
    # padded fallback (one HBM copy) with large aligned tiles + in-kernel mask
    L = 1024
    cap_rows = max(row_align, ((max_tile_vox // L) // row_align) * row_align)
    R = _cdiv(dhw, L)
    tile_r = min(cap_rows, _cdiv(R, row_align) * row_align)
    n_tiles = _cdiv(R, tile_r)
    return L, tile_r, n_tiles, n_tiles * tile_r * L


@functools.partial(jax.jit, static_argnames=("max_tile_vox", "vmem_limit_bytes"))
def hybrid_loss(preds, targets, *, max_tile_vox=None, vmem_limit_bytes=None):
    """preds: (B, 4, D, H, W) logits (f32 or bf16); targets: (B, D, H, W) class
    ids (int32/int16/int8) -> scalar hybrid (focal + weighted dice) loss."""
    if max_tile_vox is None:
        max_tile_vox = _DEFAULT_TILE_VOX
    if vmem_limit_bytes is None:
        vmem_limit_bytes = _DEFAULT_VMEM_LIMIT

    B, C, D, H, W = preds.shape
    assert C == NUM_CLASSES
    dhw = D * H * W

    # Narrow integer labels are streamed as-is (halves label traffic); anything
    # else (e.g. uint / int64) is normalized to int32.
    if targets.dtype not in (jnp.int8, jnp.int16, jnp.int32):
        targets = targets.astype(jnp.int32)
    # sublane alignment for the narrowest streamed dtype: 4B->8, 2B->16, 1B->32
    row_align = 32 // min(preds.dtype.itemsize, targets.dtype.itemsize)

    L, tile_r, n_tiles, dhw_pad = _choose_layout(dhw, max_tile_vox, row_align)
    R = n_tiles * tile_r
    # Split the voxel reduction across a second parallel grid axis so both
    # v7x TensorCores have work even at B == 1 (neutral on single-TC chips).
    n_split = 2 if (n_tiles >= 2 and n_tiles % 2 == 0) else 1
    n_inner = n_tiles // n_split

    logits = preds.reshape(B, C, dhw)                 # zero-copy view
    tgt = targets.reshape(B, dhw)                     # zero-copy view
    if dhw_pad != dhw:
        pad = dhw_pad - dhw                           # fallback only: copies once
        logits = jnp.pad(logits, ((0, 0), (0, 0), (0, pad)))
        tgt = jnp.pad(tgt, ((0, 0), (0, pad)))
    logits = logits.reshape(B, C, R, L)
    tgt = tgt.reshape(B, R, L)

    kernel = functools.partial(
        _hybrid_stats_kernel,
        valid_vox=dhw, tile_vox=tile_r * L, n_inner=n_inner,
        need_mask=(dhw_pad != dhw))

    stats, focal_sum = pl.pallas_call(
        kernel,
        out_shape=(jax.ShapeDtypeStruct((B * n_split, NUM_CLASSES, 3), jnp.float32),
                   jax.ShapeDtypeStruct((B * n_split, 1, 1), jnp.float32)),
        grid=(B, n_split, n_inner),
        in_specs=[
            pl.BlockSpec((None, NUM_CLASSES, tile_r, L),
                         lambda b, p, i: (b, 0, p * n_inner + i, 0)),
            pl.BlockSpec((None, tile_r, L),
                         lambda b, p, i: (b, p * n_inner + i, 0)),
        ],
        out_specs=(
            pl.BlockSpec((None, NUM_CLASSES, 3),
                         lambda b, p, i: (b * n_split + p, 0, 0)),
            pl.BlockSpec((None, 1, 1),
                         lambda b, p, i: (b * n_split + p, 0, 0)),
        ),
        compiler_params=pltpu.CompilerParams(
            dimension_semantics=("parallel", "parallel", "arbitrary"),
            vmem_limit_bytes=vmem_limit_bytes),
    )(logits, tgt)

    agg = jnp.sum(stats, axis=0)                      # (C, 3) over batch & split
    inter = agg[:, 0]
    psum = agg[:, 1]
    tsum = agg[:, 2]
    n_total = jnp.float32(B * dhw)
    # class-3 pred/target sums recovered from the per-voxel sum-to-one identity
    psum = psum.at[NUM_CLASSES - 1].set(n_total - jnp.sum(psum[:NUM_CLASSES - 1]))
    tsum = tsum.at[NUM_CLASSES - 1].set(n_total - jnp.sum(tsum[:NUM_CLASSES - 1]))

    w = jnp.asarray(ALPHA, jnp.float32)
    dice_loss = jnp.sum(w * (1.0 - (2.0 * inter + EPS) / (psum + tsum + EPS)))
    focal_mean = jnp.sum(focal_sum) / n_total
    return focal_mean + dice_loss


def _reference_hybrid_loss(preds, targets):
    """Pure-JAX reference matching the PyTorch module semantics exactly."""
    C = preds.shape[1]
    logits = preds.astype(jnp.float32)
    logp = jax.nn.log_softmax(logits, axis=1)
    onehot = jax.nn.one_hot(targets, C, axis=1, dtype=jnp.float32)
    alpha = jnp.asarray(ALPHA, jnp.float32).reshape((1, C) + (1,) * (preds.ndim - 2))
    ce = jnp.sum(onehot * (-logp) * alpha, axis=1)
    pt = jnp.exp(-ce)
    focal = jnp.mean((1.0 - pt) ** GAMMA * ce)

    probs = jax.nn.softmax(logits, axis=1)
    red_axes = (0,) + tuple(range(2, preds.ndim))
    inter = jnp.sum(probs * onehot, axis=red_axes)
    psum = jnp.sum(probs, axis=red_axes)
    tsum = jnp.sum(onehot, axis=red_axes)
    dice = jnp.sum(jnp.asarray(ALPHA, jnp.float32)
                   * (1.0 - (2.0 * inter + EPS) / (psum + tsum + EPS)))
    return focal + dice


if __name__ == "__main__":
    key = jax.random.PRNGKey(0)

    def _check(idx, shape, logits_dtype=jnp.float32, tgt_dtype=jnp.int32, **kw):
        B, C, D, H, W = shape
        k1, k2 = jax.random.split(jax.random.fold_in(key, idx))
        preds = jax.random.normal(k1, (B, C, D, H, W), dtype=jnp.float32)
        preds = preds.astype(logits_dtype)
        targets = jax.random.randint(k2, (B, D, H, W), 0, C, dtype=jnp.int32)
        targets = targets.astype(tgt_dtype)
        out = jax.block_until_ready(hybrid_loss(preds, targets, **kw))
        ref = jax.block_until_ready(_reference_hybrid_loss(preds, targets))
        assert jnp.allclose(out, ref, rtol=5e-3, atol=1e-3), (shape, out, ref)

    # zero-copy path, batch axis parallel, single tile per batch element
    _check(0, (2, NUM_CLASSES, 8, 16, 16))
    # multiple row tiles: exercises the split reduction (n_split=2) + resident
    # accumulation over the "arbitrary" axis
    _check(1, (1, NUM_CLASSES, 32, 64, 64), max_tile_vox=32 * 1024)
    # ragged voxel count -> padded fallback with sentinel-target validity mask
    _check(2, (1, NUM_CLASSES, 5, 7, 9))
    # bf16 logits streamed end-to-end (kernel upcasts per class plane)
    _check(3, (1, NUM_CLASSES, 16, 32, 32), logits_dtype=jnp.bfloat16)

    print("KERNEL_OK")
</pallas_src>

<mosaic_0001>
module attributes {stable_mosaic.version = 11 : i64} {
  func.func @_hybrid_stats_kernel(%arg0: i32, %arg1: i32, %arg2: i32, %arg3: memref<1x4x1x2048xf32, #tpu.memory_space<vmem>>, %arg4: memref<1x1x2048xi32, #tpu.memory_space<vmem>>, %arg5: memref<1x4x3xf32, #tpu.memory_space<vmem>>, %arg6: memref<1x1x1xf32, #tpu.memory_space<vmem>>) attributes {dimension_semantics = [#tpu.dimension_semantics<parallel>, #tpu.dimension_semantics<parallel>, #tpu.dimension_semantics<arbitrary>], iteration_bounds = array<i64: 2, 1, 1>, scalar_prefetch = 0 : i64, scratch_operands = 0 : i64, tpu.core_type = #tpu.core_type<tc>, window_params = [{transform_indices = @transform_0, window_bounds = array<i64: 1, 4, 1, 2048>}, {transform_indices = @transform_1, window_bounds = array<i64: 1, 1, 2048>}, {transform_indices = @transform_2, window_bounds = array<i64: 1, 4, 3>}, {transform_indices = @transform_3, window_bounds = array<i64: 1, 1, 1>}]} {
    %c0_i32 = arith.constant 0 : i32
    %0 = arith.cmpi eq, %arg2, %c0_i32 : i32
    %1 = arith.extui %0 : i1 to i32
    %c0_i32_0 = arith.constant 0 : i32
    %2 = arith.cmpi ne, %1, %c0_i32_0 : i32
    scf.if %2 {
      %cst_109 = arith.constant 0.000000e+00 : f32
      %198 = vector.broadcast %cst_109 : f32 to vector<4x3xf32>
      %c0_110 = arith.constant 0 : index
      %c0_111 = arith.constant 0 : index
      %c0_112 = arith.constant 0 : index
      %199 = vector.load %arg5[%c0_110, %c0_111, %c0_112] : memref<1x4x3xf32, #tpu.memory_space<vmem>>, vector<1x4x3xf32>
      %200 = vector.shape_cast %199 : vector<1x4x3xf32> to vector<4x3xf32>
      %201 = vector.shape_cast %198 : vector<4x3xf32> to vector<1x4x3xf32>
      tpu.vector_store %arg5[%c0_110, %c0_111, %c0_112], %201 {strides = array<i32>} : memref<1x4x3xf32, #tpu.memory_space<vmem>>, vector<1x4x3xf32>,
      %cst_113 = arith.constant 0.000000e+00 : f32
      %202 = vector.broadcast %cst_113 : f32 to vector<1x1xf32>
      %c0_114 = arith.constant 0 : index
      %c0_115 = arith.constant 0 : index
      %c0_116 = arith.constant 0 : index
      %203 = vector.load %arg6[%c0_114, %c0_115, %c0_116] : memref<1x1x1xf32, #tpu.memory_space<vmem>>, vector<1x1x1xf32>
      %204 = vector.shape_cast %203 : vector<1x1x1xf32> to vector<1x1xf32>
      %205 = vector.shape_cast %202 : vector<1x1xf32> to vector<1x1x1xf32>
      tpu.vector_store %arg6[%c0_114, %c0_115, %c0_116], %205 {strides = array<i32>} : memref<1x1x1xf32, #tpu.memory_space<vmem>>, vector<1x1x1xf32>,
    } else {
    }
    %c0 = arith.constant 0 : index
    %c0_1 = arith.constant 0 : index
    %c0_2 = arith.constant 0 : index
    %3 = vector.load %arg4[%c0, %c0_1, %c0_2] : memref<1x1x2048xi32, #tpu.memory_space<vmem>>, vector<1x1x2048xi32>
    %4 = vector.shape_cast %3 : vector<1x1x2048xi32> to vector<1x2048xi32>
    %c0_3 = arith.constant 0 : index
    %c0_4 = arith.constant 0 : index
    %c0_5 = arith.constant 0 : index
    %c0_6 = arith.constant 0 : index
    %5 = vector.load %arg3[%c0_3, %c0_4, %c0_5, %c0_6] : memref<1x4x1x2048xf32, #tpu.memory_space<vmem>>, vector<1x1x1x2048xf32>
    %6 = vector.shape_cast %5 : vector<1x1x1x2048xf32> to vector<1x2048xf32>
    %c0_7 = arith.constant 0 : index
    %c1 = arith.constant 1 : index
    %c0_8 = arith.constant 0 : index
    %c0_9 = arith.constant 0 : index
    %7 = vector.load %arg3[%c0_7, %c1, %c0_8, %c0_9] : memref<1x4x1x2048xf32, #tpu.memory_space<vmem>>, vector<1x1x1x2048xf32>
    %8 = vector.shape_cast %7 : vector<1x1x1x2048xf32> to vector<1x2048xf32>
    %c0_10 = arith.constant 0 : index
    %c2 = arith.constant 2 : index
    %c0_11 = arith.constant 0 : index
    %c0_12 = arith.constant 0 : index
    %9 = vector.load %arg3[%c0_10, %c2, %c0_11, %c0_12] : memref<1x4x1x2048xf32, #tpu.memory_space<vmem>>, vector<1x1x1x2048xf32>
    %10 = vector.shape_cast %9 : vector<1x1x1x2048xf32> to vector<1x2048xf32>
    %c0_13 = arith.constant 0 : index
    %c3 = arith.constant 3 : index
    %c0_14 = arith.constant 0 : index
    %c0_15 = arith.constant 0 : index
    %11 = vector.load %arg3[%c0_13, %c3, %c0_14, %c0_15] : memref<1x4x1x2048xf32, #tpu.memory_space<vmem>>, vector<1x1x1x2048xf32>
    %12 = vector.shape_cast %11 : vector<1x1x1x2048xf32> to vector<1x2048xf32>
    %13 = arith.maximumf %6, %8 : vector<1x2048xf32>
    %14 = arith.maximumf %10, %12 : vector<1x2048xf32>
    %15 = arith.maximumf %13, %14 : vector<1x2048xf32>
    %16 = arith.subf %6, %15 : vector<1x2048xf32>
    %17 = arith.subf %8, %15 : vector<1x2048xf32>
    %18 = arith.subf %10, %15 : vector<1x2048xf32>
    %19 = arith.subf %12, %15 : vector<1x2048xf32>
    %20 = math.exp %16 : vector<1x2048xf32>
    %21 = math.exp %17 : vector<1x2048xf32>
    %22 = math.exp %18 : vector<1x2048xf32>
    %23 = math.exp %19 : vector<1x2048xf32>
    %24 = arith.addf %20, %21 : vector<1x2048xf32>
    %25 = arith.addf %22, %23 : vector<1x2048xf32>
    %26 = arith.addf %24, %25 : vector<1x2048xf32>
    %27 = tpu.reciprocal %26 {approx = true} : vector<1x2048xf32> -> vector<1x2048xf32>
    %28 = math.log %26 : vector<1x2048xf32>
    %c0_i32_16 = arith.constant 0 : i32
    %29 = vector.broadcast %c0_i32_16 : i32 to vector<1x2048xi32>
    %30 = arith.cmpi eq, %4, %29 : vector<1x2048xi32>
    %c1_i32 = arith.constant 1 : i32
    %31 = vector.broadcast %c1_i32 : i32 to vector<1x2048xi32>
    %32 = arith.cmpi eq, %4, %31 : vector<1x2048xi32>
    %c2_i32 = arith.constant 2 : i32
    %33 = vector.broadcast %c2_i32 : i32 to vector<1x2048xi32>
    %34 = arith.cmpi eq, %4, %33 : vector<1x2048xi32>
    %c3_i32 = arith.constant 3 : i32
    %35 = vector.broadcast %c3_i32 : i32 to vector<1x2048xi32>
    %36 = arith.cmpi eq, %4, %35 : vector<1x2048xi32>
    %37 = arith.select %32, %17, %16 : vector<1x2048xi1>, vector<1x2048xf32>
    %38 = arith.select %34, %18, %37 : vector<1x2048xi1>, vector<1x2048xf32>
    %39 = arith.select %36, %19, %38 : vector<1x2048xi1>, vector<1x2048xf32>
    %cst = arith.constant 4.000000e+00 : f32
    %cst_17 = arith.constant 0.00999999977 : f32
    %40 = vector.broadcast %cst : f32 to vector<1x2048xf32>
    %41 = vector.broadcast %cst_17 : f32 to vector<1x2048xf32>
    %42 = arith.select %32, %40, %41 : vector<1x2048xi1>, vector<1x2048xf32>
    %cst_18 = arith.constant 1.800000e+00 : f32
    %43 = vector.broadcast %cst_18 : f32 to vector<1x2048xf32>
    %44 = arith.select %34, %43, %42 : vector<1x2048xi1>, vector<1x2048xf32>
    %cst_19 = arith.constant 6.000000e+00 : f32
    %45 = vector.broadcast %cst_19 : f32 to vector<1x2048xf32>
    %46 = arith.select %36, %45, %44 : vector<1x2048xi1>, vector<1x2048xf32>
    %47 = arith.subf %28, %39 : vector<1x2048xf32>
    %48 = arith.mulf %46, %47 : vector<1x2048xf32>
    %cst_20 = arith.constant 0.000000e+00 : f32
    %49 = vector.broadcast %cst_20 : f32 to vector<1x2048xf32>
    %50 = arith.subf %49, %48 : vector<1x2048xf32>
    %51 = math.exp %50 : vector<1x2048xf32>
    %cst_21 = arith.constant 1.000000e+00 : f32
    %52 = vector.broadcast %cst_21 : f32 to vector<1x2048xf32>
    %53 = arith.subf %52, %51 : vector<1x2048xf32>
    %54 = arith.mulf %53, %53 : vector<1x2048xf32>
    %55 = arith.mulf %54, %48 : vector<1x2048xf32>
    %c0_22 = arith.constant 0 : index
    %c0_23 = arith.constant 0 : index
    %c0_24 = arith.constant 0 : index
    %56 = vector.load %arg6[%c0_22, %c0_23, %c0_24] : memref<1x1x1xf32, #tpu.memory_space<vmem>>, vector<1x1x1xf32>
    %57 = vector.shape_cast %56 : vector<1x1x1xf32> to vector<1x1xf32>
    %58 = vector.shape_cast %55 : vector<1x2048xf32> to vector<1x1x2048xf32>
    %cst_25 = arith.constant dense<0.000000e+00> : vector<1xf32>
    %59 = vector.multi_reduction <add>, %58, %cst_25 [1, 2] : vector<1x1x2048xf32> to vector<1xf32>
    %60 = vector.shape_cast %59 : vector<1xf32> to vector<1x1x1xf32>
    %61 = vector.extract %60[0, 0, 0] : f32 from vector<1x1x1xf32>
    %62 = vector.broadcast %61 : f32 to vector<1x1xf32>
    %63 = arith.addf %57, %62 : vector<1x1xf32>
    %c0_26 = arith.constant 0 : index
    %c0_27 = arith.constant 0 : index
    %c0_28 = arith.constant 0 : index
    %64 = vector.load %arg6[%c0_26, %c0_27, %c0_28] : memref<1x1x1xf32, #tpu.memory_space<vmem>>, vector<1x1x1xf32>
    %65 = vector.shape_cast %64 : vector<1x1x1xf32> to vector<1x1xf32>
    %66 = vector.shape_cast %63 : vector<1x1xf32> to vector<1x1x1xf32>
    tpu.vector_store %arg6[%c0_26, %c0_27, %c0_28], %66 {strides = array<i32>} : memref<1x1x1xf32, #tpu.memory_space<vmem>>, vector<1x1x1xf32>,
    %67 = arith.mulf %20, %27 : vector<1x2048xf32>
    %c0_29 = arith.constant 0 : index
    %c0_30 = arith.constant 0 : index
    %c0_31 = arith.constant 0 : index
    %68 = vector.load %arg5[%c0_29, %c0_30, %c0_31] : memref<1x4x3xf32, #tpu.memory_space<vmem>>, vector<1x1x1xf32>
    %69 = vector.shape_cast %68 : vector<1x1x1xf32> to vector<1x1xf32>
    %cst_32 = arith.constant 0.000000e+00 : f32
    %70 = vector.broadcast %cst_32 : f32 to vector<1x2048xf32>
    %71 = arith.select %30, %67, %70 : vector<1x2048xi1>, vector<1x2048xf32>
    %72 = vector.shape_cast %71 : vector<1x2048xf32> to vector<1x1x2048xf32>
    %cst_33 = arith.constant dense<0.000000e+00> : vector<1xf32>
    %73 = vector.multi_reduction <add>, %72, %cst_33 [1, 2] : vector<1x1x2048xf32> to vector<1xf32>
    %74 = vector.shape_cast %73 : vector<1xf32> to vector<1x1x1xf32>
    %75 = vector.extract %74[0, 0, 0] : f32 from vector<1x1x1xf32>
    %76 = vector.broadcast %75 : f32 to vector<1x1xf32>
    %77 = arith.addf %69, %76 : vector<1x1xf32>
    %c0_34 = arith.constant 0 : index
    %c0_35 = arith.constant 0 : index
    %c0_36 = arith.constant 0 : index
    %78 = vector.load %arg5[%c0_34, %c0_35, %c0_36] : memref<1x4x3xf32, #tpu.memory_space<vmem>>, vector<1x1x1xf32>
    %79 = vector.shape_cast %78 : vector<1x1x1xf32> to vector<1x1xf32>
    %80 = vector.shape_cast %77 : vector<1x1xf32> to vector<1x1x1xf32>
    tpu.vector_store %arg5[%c0_34, %c0_35, %c0_36], %80 {strides = array<i32>} : memref<1x4x3xf32, #tpu.memory_space<vmem>>, vector<1x1x1xf32>,
    %c0_37 = arith.constant 0 : index
    %c0_38 = arith.constant 0 : index
    %c1_39 = arith.constant 1 : index
    %81 = vector.load %arg5[%c0_37, %c0_38, %c1_39] : memref<1x4x3xf32, #tpu.memory_space<vmem>>, vector<1x1x1xf32>
    %82 = vector.shape_cast %81 : vector<1x1x1xf32> to vector<1x1xf32>
    %83 = vector.shape_cast %67 : vector<1x2048xf32> to vector<1x1x2048xf32>
    %cst_40 = arith.constant dense<0.000000e+00> : vector<1xf32>
    %84 = vector.multi_reduction <add>, %83, %cst_40 [1, 2] : vector<1x1x2048xf32> to vector<1xf32>
    %85 = vector.shape_cast %84 : vector<1xf32> to vector<1x1x1xf32>
    %86 = vector.extract %85[0, 0, 0] : f32 from vector<1x1x1xf32>
    %87 = vector.broadcast %86 : f32 to vector<1x1xf32>
    %88 = arith.addf %82, %87 : vector<1x1xf32>
    %c0_41 = arith.constant 0 : index
    %c0_42 = arith.constant 0 : index
    %c1_43 = arith.constant 1 : index
    %89 = vector.load %arg5[%c0_41, %c0_42, %c1_43] : memref<1x4x3xf32, #tpu.memory_space<vmem>>, vector<1x1x1xf32>
    %90 = vector.shape_cast %89 : vector<1x1x1xf32> to vector<1x1xf32>
    %91 = vector.shape_cast %88 : vector<1x1xf32> to vector<1x1x1xf32>
    tpu.vector_store %arg5[%c0_41, %c0_42, %c1_43], %91 {strides = array<i32>} : memref<1x4x3xf32, #tpu.memory_space<vmem>>, vector<1x1x1xf32>,
    %c0_44 = arith.constant 0 : index
    %c0_45 = arith.constant 0 : index
    %c2_46 = arith.constant 2 : index
    %92 = vector.load %arg5[%c0_44, %c0_45, %c2_46] : memref<1x4x3xf32, #tpu.memory_space<vmem>>, vector<1x1x1xf32>
    %93 = vector.shape_cast %92 : vector<1x1x1xf32> to vector<1x1xf32>
    %cst_47 = arith.constant 1.000000e+00 : f32
    %cst_48 = arith.constant 0.000000e+00 : f32
    %94 = vector.broadcast %cst_47 : f32 to vector<1x2048xf32>
    %95 = vector.broadcast %cst_48 : f32 to vector<1x2048xf32>
    %96 = arith.select %30, %94, %95 : vector<1x2048xi1>, vector<1x2048xf32>
    %97 = vector.shape_cast %96 : vector<1x2048xf32> to vector<1x1x2048xf32>
    %cst_49 = arith.constant dense<0.000000e+00> : vector<1xf32>
    %98 = vector.multi_reduction <add>, %97, %cst_49 [1, 2] : vector<1x1x2048xf32> to vector<1xf32>
    %99 = vector.shape_cast %98 : vector<1xf32> to vector<1x1x1xf32>
    %100 = vector.extract %99[0, 0, 0] : f32 from vector<1x1x1xf32>
    %101 = vector.broadcast %100 : f32 to vector<1x1xf32>
    %102 = arith.addf %93, %101 : vector<1x1xf32>
    %c0_50 = arith.constant 0 : index
    %c0_51 = arith.constant 0 : index
    %c2_52 = arith.constant 2 : index
    %103 = vector.load %arg5[%c0_50, %c0_51, %c2_52] : memref<1x4x3xf32, #tpu.memory_space<vmem>>, vector<1x1x1xf32>
    %104 = vector.shape_cast %103 : vector<1x1x1xf32> to vector<1x1xf32>
    %105 = vector.shape_cast %102 : vector<1x1xf32> to vector<1x1x1xf32>
    tpu.vector_store %arg5[%c0_50, %c0_51, %c2_52], %105 {strides = array<i32>} : memref<1x4x3xf32, #tpu.memory_space<vmem>>, vector<1x1x1xf32>,
    %106 = arith.mulf %21, %27 : vector<1x2048xf32>
    %c0_53 = arith.constant 0 : index
    %c1_54 = arith.constant 1 : index
    %c0_55 = arith.constant 0 : index
    %107 = vector.load %arg5[%c0_53, %c1_54, %c0_55] : memref<1x4x3xf32, #tpu.memory_space<vmem>>, vector<1x1x1xf32>
    %108 = vector.shape_cast %107 : vector<1x1x1xf32> to vector<1x1xf32>
    %cst_56 = arith.constant 0.000000e+00 : f32
    %109 = vector.broadcast %cst_56 : f32 to vector<1x2048xf32>
    %110 = arith.select %32, %106, %109 : vector<1x2048xi1>, vector<1x2048xf32>
    %111 = vector.shape_cast %110 : vector<1x2048xf32> to vector<1x1x2048xf32>
    %cst_57 = arith.constant dense<0.000000e+00> : vector<1xf32>
    %112 = vector.multi_reduction <add>, %111, %cst_57 [1, 2] : vector<1x1x2048xf32> to vector<1xf32>
    %113 = vector.shape_cast %112 : vector<1xf32> to vector<1x1x1xf32>
    %114 = vector.extract %113[0, 0, 0] : f32 from vector<1x1x1xf32>
    %115 = vector.broadcast %114 : f32 to vector<1x1xf32>
    %116 = arith.addf %108, %115 : vector<1x1xf32>
    %c0_58 = arith.constant 0 : index
    %c1_59 = arith.constant 1 : index
    %c0_60 = arith.constant 0 : index
    %117 = vector.load %arg5[%c0_58, %c1_59, %c0_60] : memref<1x4x3xf32, #tpu.memory_space<vmem>>, vector<1x1x1xf32>
    %118 = vector.shape_cast %117 : vector<1x1x1xf32> to vector<1x1xf32>
    %119 = vector.shape_cast %116 : vector<1x1xf32> to vector<1x1x1xf32>
    tpu.vector_store %arg5[%c0_58, %c1_59, %c0_60], %119 {strides = array<i32>} : memref<1x4x3xf32, #tpu.memory_space<vmem>>, vector<1x1x1xf32>,
    %c0_61 = arith.constant 0 : index
    %c1_62 = arith.constant 1 : index
    %c1_63 = arith.constant 1 : index
    %120 = vector.load %arg5[%c0_61, %c1_62, %c1_63] : memref<1x4x3xf32, #tpu.memory_space<vmem>>, vector<1x1x1xf32>
    %121 = vector.shape_cast %120 : vector<1x1x1xf32> to vector<1x1xf32>
    %122 = vector.shape_cast %106 : vector<1x2048xf32> to vector<1x1x2048xf32>
    %cst_64 = arith.constant dense<0.000000e+00> : vector<1xf32>
    %123 = vector.multi_reduction <add>, %122, %cst_64 [1, 2] : vector<1x1x2048xf32> to vector<1xf32>
    %124 = vector.shape_cast %123 : vector<1xf32> to vector<1x1x1xf32>
    %125 = vector.extract %124[0, 0, 0] : f32 from vector<1x1x1xf32>
    %126 = vector.broadcast %125 : f32 to vector<1x1xf32>
    %127 = arith.addf %121, %126 : vector<1x1xf32>
    %c0_65 = arith.constant 0 : index
    %c1_66 = arith.constant 1 : index
    %c1_67 = arith.constant 1 : index
    %128 = vector.load %arg5[%c0_65, %c1_66, %c1_67] : memref<1x4x3xf32, #tpu.memory_space<vmem>>, vector<1x1x1xf32>
    %129 = vector.shape_cast %128 : vector<1x1x1xf32> to vector<1x1xf32>
    %130 = vector.shape_cast %127 : vector<1x1xf32> to vector<1x1x1xf32>
    tpu.vector_store %arg5[%c0_65, %c1_66, %c1_67], %130 {strides = array<i32>} : memref<1x4x3xf32, #tpu.memory_space<vmem>>, vector<1x1x1xf32>,
    %c0_68 = arith.constant 0 : index
    %c1_69 = arith.constant 1 : index
    %c2_70 = arith.constant 2 : index
    %131 = vector.load %arg5[%c0_68, %c1_69, %c2_70] : memref<1x4x3xf32, #tpu.memory_space<vmem>>, vector<1x1x1xf32>
    %132 = vector.shape_cast %131 : vector<1x1x1xf32> to vector<1x1xf32>
    %cst_71 = arith.constant 1.000000e+00 : f32
    %cst_72 = arith.constant 0.000000e+00 : f32
    %133 = vector.broadcast %cst_71 : f32 to vector<1x2048xf32>
    %134 = vector.broadcast %cst_72 : f32 to vector<1x2048xf32>
    %135 = arith.select %32, %133, %134 : vector<1x2048xi1>, vector<1x2048xf32>
    %136 = vector.shape_cast %135 : vector<1x2048xf32> to vector<1x1x2048xf32>
    %cst_73 = arith.constant dense<0.000000e+00> : vector<1xf32>
    %137 = vector.multi_reduction <add>, %136, %cst_73 [1, 2] : vector<1x1x2048xf32> to vector<1xf32>
    %138 = vector.shape_cast %137 : vector<1xf32> to vector<1x1x1xf32>
    %139 = vector.extract %138[0, 0, 0] : f32 from vector<1x1x1xf32>
    %140 = vector.broadcast %139 : f32 to vector<1x1xf32>
    %141 = arith.addf %132, %140 : vector<1x1xf32>
    %c0_74 = arith.constant 0 : index
    %c1_75 = arith.constant 1 : index
    %c2_76 = arith.constant 2 : index
    %142 = vector.load %arg5[%c0_74, %c1_75, %c2_76] : memref<1x4x3xf32, #tpu.memory_space<vmem>>, vector<1x1x1xf32>
    %143 = vector.shape_cast %142 : vector<1x1x1xf32> to vector<1x1xf32>
    %144 = vector.shape_cast %141 : vector<1x1xf32> to vector<1x1x1xf32>
    tpu.vector_store %arg5[%c0_74, %c1_75, %c2_76], %144 {strides = array<i32>} : memref<1x4x3xf32, #tpu.memory_space<vmem>>, vector<1x1x1xf32>,
    %145 = arith.mulf %22, %27 : vector<1x2048xf32>
    %c0_77 = arith.constant 0 : index
    %c2_78 = arith.constant 2 : index
    %c0_79 = arith.constant 0 : index
    %146 = vector.load %arg5[%c0_77, %c2_78, %c0_79] : memref<1x4x3xf32, #tpu.memory_space<vmem>>, vector<1x1x1xf32>
    %147 = vector.shape_cast %146 : vector<1x1x1xf32> to vector<1x1xf32>
    %cst_80 = arith.constant 0.000000e+00 : f32
    %148 = vector.broadcast %cst_80 : f32 to vector<1x2048xf32>
    %149 = arith.select %34, %145, %148 : vector<1x2048xi1>, vector<1x2048xf32>
    %150 = vector.shape_cast %149 : vector<1x2048xf32> to vector<1x1x2048xf32>
    %cst_81 = arith.constant dense<0.000000e+00> : vector<1xf32>
    %151 = vector.multi_reduction <add>, %150, %cst_81 [1, 2] : vector<1x1x2048xf32> to vector<1xf32>
    %152 = vector.shape_cast %151 : vector<1xf32> to vector<1x1x1xf32>
    %153 = vector.extract %152[0, 0, 0] : f32 from vector<1x1x1xf32>
    %154 = vector.broadcast %153 : f32 to vector<1x1xf32>
    %155 = arith.addf %147, %154 : vector<1x1xf32>
    %c0_82 = arith.constant 0 : index
    %c2_83 = arith.constant 2 : index
    %c0_84 = arith.constant 0 : index
    %156 = vector.load %arg5[%c0_82, %c2_83, %c0_84] : memref<1x4x3xf32, #tpu.memory_space<vmem>>, vector<1x1x1xf32>
    %157 = vector.shape_cast %156 : vector<1x1x1xf32> to vector<1x1xf32>
    %158 = vector.shape_cast %155 : vector<1x1xf32> to vector<1x1x1xf32>
    tpu.vector_store %arg5[%c0_82, %c2_83, %c0_84], %158 {strides = array<i32>} : memref<1x4x3xf32, #tpu.memory_space<vmem>>, vector<1x1x1xf32>,
    %c0_85 = arith.constant 0 : index
    %c2_86 = arith.constant 2 : index
    %c1_87 = arith.constant 1 : index
    %159 = vector.load %arg5[%c0_85, %c2_86, %c1_87] : memref<1x4x3xf32, #tpu.memory_space<vmem>>, vector<1x1x1xf32>
    %160 = vector.shape_cast %159 : vector<1x1x1xf32> to vector<1x1xf32>
    %161 = vector.shape_cast %145 : vector<1x2048xf32> to vector<1x1x2048xf32>
    %cst_88 = arith.constant dense<0.000000e+00> : vector<1xf32>
    %162 = vector.multi_reduction <add>, %161, %cst_88 [1, 2] : vector<1x1x2048xf32> to vector<1xf32>
    %163 = vector.shape_cast %162 : vector<1xf32> to vector<1x1x1xf32>
    %164 = vector.extract %163[0, 0, 0] : f32 from vector<1x1x1xf32>
    %165 = vector.broadcast %164 : f32 to vector<1x1xf32>
    %166 = arith.addf %160, %165 : vector<1x1xf32>
    %c0_89 = arith.constant 0 : index
    %c2_90 = arith.constant 2 : index
    %c1_91 = arith.constant 1 : index
    %167 = vector.load %arg5[%c0_89, %c2_90, %c1_91] : memref<1x4x3xf32, #tpu.memory_space<vmem>>, vector<1x1x1xf32>
    %168 = vector.shape_cast %167 : vector<1x1x1xf32> to vector<1x1xf32>
    %169 = vector.shape_cast %166 : vector<1x1xf32> to vector<1x1x1xf32>
    tpu.vector_store %arg5[%c0_89, %c2_90, %c1_91], %169 {strides = array<i32>} : memref<1x4x3xf32, #tpu.memory_space<vmem>>, vector<1x1x1xf32>,
    %c0_92 = arith.constant 0 : index
    %c2_93 = arith.constant 2 : index
    %c2_94 = arith.constant 2 : index
    %170 = vector.load %arg5[%c0_92, %c2_93, %c2_94] : memref<1x4x3xf32, #tpu.memory_space<vmem>>, vector<1x1x1xf32>
    %171 = vector.shape_cast %170 : vector<1x1x1xf32> to vector<1x1xf32>
    %cst_95 = arith.constant 1.000000e+00 : f32
    %cst_96 = arith.constant 0.000000e+00 : f32
    %172 = vector.broadcast %cst_95 : f32 to vector<1x2048xf32>
    %173 = vector.broadcast %cst_96 : f32 to vector<1x2048xf32>
    %174 = arith.select %34, %172, %173 : vector<1x2048xi1>, vector<1x2048xf32>
    %175 = vector.shape_cast %174 : vector<1x2048xf32> to vector<1x1x2048xf32>
    %cst_97 = arith.constant dense<0.000000e+00> : vector<1xf32>
    %176 = vector.multi_reduction <add>, %175, %cst_97 [1, 2] : vector<1x1x2048xf32> to vector<1xf32>
    %177 = vector.shape_cast %176 : vector<1xf32> to vector<1x1x1xf32>
    %178 = vector.extract %177[0, 0, 0] : f32 from vector<1x1x1xf32>
    %179 = vector.broadcast %178 : f32 to vector<1x1xf32>
    %180 = arith.addf %171, %179 : vector<1x1xf32>
    %c0_98 = arith.constant 0 : index
    %c2_99 = arith.constant 2 : index
    %c2_100 = arith.constant 2 : index
    %181 = vector.load %arg5[%c0_98, %c2_99, %c2_100] : memref<1x4x3xf32, #tpu.memory_space<vmem>>, vector<1x1x1xf32>
    %182 = vector.shape_cast %181 : vector<1x1x1xf32> to vector<1x1xf32>
    %183 = vector.shape_cast %180 : vector<1x1xf32> to vector<1x1x1xf32>
    tpu.vector_store %arg5[%c0_98, %c2_99, %c2_100], %183 {strides = array<i32>} : memref<1x4x3xf32, #tpu.memory_space<vmem>>, vector<1x1x1xf32>,
    %184 = arith.mulf %23, %27 : vector<1x2048xf32>
    %c0_101 = arith.constant 0 : index
    %c3_102 = arith.constant 3 : index
    %c0_103 = arith.constant 0 : index
    %185 = vector.load %arg5[%c0_101, %c3_102, %c0_103] : memref<1x4x3xf32, #tpu.memory_space<vmem>>, vector<1x1x1xf32>
    %186 = vector.shape_cast %185 : vector<1x1x1xf32> to vector<1x1xf32>
    %cst_104 = arith.constant 0.000000e+00 : f32
    %187 = vector.broadcast %cst_104 : f32 to vector<1x2048xf32>
    %188 = arith.select %36, %184, %187 : vector<1x2048xi1>, vector<1x2048xf32>
    %189 = vector.shape_cast %188 : vector<1x2048xf32> to vector<1x1x2048xf32>
    %cst_105 = arith.constant dense<0.000000e+00> : vector<1xf32>
    %190 = vector.multi_reduction <add>, %189, %cst_105 [1, 2] : vector<1x1x2048xf32> to vector<1xf32>
    %191 = vector.shape_cast %190 : vector<1xf32> to vector<1x1x1xf32>
    %192 = vector.extract %191[0, 0, 0] : f32 from vector<1x1x1xf32>
    %193 = vector.broadcast %192 : f32 to vector<1x1xf32>
    %194 = arith.addf %186, %193 : vector<1x1xf32>
    %c0_106 = arith.constant 0 : index
    %c3_107 = arith.constant 3 : index
    %c0_108 = arith.constant 0 : index
    %195 = vector.load %arg5[%c0_106, %c3_107, %c0_108] : memref<1x4x3xf32, #tpu.memory_space<vmem>>, vector<1x1x1xf32>
    %196 = vector.shape_cast %195 : vector<1x1x1xf32> to vector<1x1xf32>
    %197 = vector.shape_cast %194 : vector<1x1xf32> to vector<1x1x1xf32>
    tpu.vector_store %arg5[%c0_106, %c3_107, %c0_108], %197 {strides = array<i32>} : memref<1x4x3xf32, #tpu.memory_space<vmem>>, vector<1x1x1xf32>,
    return
  }
  func.func @transform_0(%arg0: i32, %arg1: i32, %arg2: i32) -> (i32, i32, i32, i32) {
    %c1_i32 = arith.constant 1 : i32
    %0 = arith.muli %arg1, %c1_i32 : i32
    %1 = arith.addi %0, %arg2 : i32
    %c0_i32 = arith.constant 0 : i32
    %c0_i32_0 = arith.constant 0 : i32
    %c0_i32_1 = arith.constant 0 : i32
    return %arg0, %c0_i32, %1, %c0_i32_0 : i32, i32, i32, i32
  }
  func.func @transform_1(%arg0: i32, %arg1: i32, %arg2: i32) -> (i32, i32, i32) {
    %c1_i32 = arith.constant 1 : i32
    %0 = arith.muli %arg1, %c1_i32 : i32
    %1 = arith.addi %0, %arg2 : i32
    %c0_i32 = arith.constant 0 : i32
    %c0_i32_0 = arith.constant 0 : i32
    return %arg0, %1, %c0_i32 : i32, i32, i32
  }
  func.func @transform_2(%arg0: i32, %arg1: i32, %arg2: i32) -> (i32, i32, i32) {
    %c1_i32 = arith.constant 1 : i32
    %0 = arith.muli %arg0, %c1_i32 : i32
    %1 = arith.addi %0, %arg1 : i32
    %c0_i32 = arith.constant 0 : i32
    %c0_i32_0 = arith.constant 0 : i32
    %c0_i32_1 = arith.constant 0 : i32
    return %1, %c0_i32, %c0_i32_0 : i32, i32, i32
  }
  func.func @transform_3(%arg0: i32, %arg1: i32, %arg2: i32) -> (i32, i32, i32) {
    %c1_i32 = arith.constant 1 : i32
    %0 = arith.muli %arg0, %c1_i32 : i32
    %1 = arith.addi %0, %arg1 : i32
    %c0_i32 = arith.constant 0 : i32
    %c0_i32_0 = arith.constant 0 : i32
    %c0_i32_1 = arith.constant 0 : i32
    return %1, %c0_i32, %c0_i32_0 : i32, i32, i32
  }
}

</mosaic_0001>

<bundles_post_ra>
// kernel: hybrid_loss.1
= control target key start
LH: loop header
LB: loop body
LE: loop exit
PB: predicated region body
PF: predicated region fallthrough
CT: control target
= control target key end

     0   :  { %s2032_s12 = smov 0   ;;  %s2034_s13 = smov 0   ;;  %s2857_s0 = inlined_call_operand.vmem [shape: f32[2,4,1,2048], index: 0, kind: input, shape index: {}]   ;;  %s2858_s1 = inlined_call_operand.vmem [shape: s32[2,1,2048], index: 1, kind: input, shape index: {}]   ;;  %s2859_s2 = inlined_call_operand.vmem [shape: f32[2,4,3], index: 2, kind: output, shape index: {0}]   ;;  %s2860_s3 = inlined_call_operand.vmem [shape: f32[2,1,1], index: 3, kind: output, shape index: {1}]  }
   0x1   :  { %s2036_s14 = smov 0  }
   0x2 LB: > { %s33_s15 = sadd.s32 1, %s2004_s13  ;;  %p1898_p0 = scmp.ge.s32.totalorder %s2008_s14, 1  ;;  %s2008_s14 = sphi %s2036_s14, %s14_s14   ;;  %s2004_s13 = sphi %s2034_s13, %s2885_s13   ;;  %s2000_s12 = sphi %s2032_s12, %s2884_s12  }
   0x3   : > { %p35_p1 = scmp.ge.s32.totalorder %s33_s15, 2  ;;  %p191_p2 = scmp.lt.s32.totalorder %s2008_s14, 3 }
   0x5   : > { %s2887_s15 = smov (%p35_p1, %s33_s15), 0  ;;  %p192_p3 = pnand %p1898_p0, %p191_p2 }
   0x7   : > { %195 = sbr.rel (%p192_p3) target bundleno = 397 (0x18d), region = 28 }
   0xe   : > { %p233_p4 = scmp.lt.s32.totalorder %s2000_s12, 1  ;;  %v365_v0 = vlaneseq  ;;  %v2861_v9 = vmov 0.0   ;;  %vm445_vm2 = vcmask 1040384   ;;  %vm269_vm9 = vcmask 0  }
   0xf   : > { %vm267_vm10 = vcmask 19456   ;;  %vm745_vm11 = vcmask 8200   ;;  %vm874_vm12 = vcmask 16400  }
  0x10   : > { %s2889_s12 = smov (!%p233_p4, %s2000_s12), 1  ;;  %v366_v1 = vshrl.u32 %v365_v0, 7 }
  0x11   : > { %s1900_s16 = sshll.u32 %s2889_s12, 4  ;;  %s1899_s20 = sshll.u32 %s2889_s12, 6 }
  0x12   : > { %s250_s19 = scalar_lea.vmem %s2858_s1, %s1900_s16  ;;  %v2056_v2 = vsub.s32 0, %v366_v1  ;;  %v2058_v3 = vsub.s32 1, %v366_v1  ;;  %v2060_v4 = vsub.s32 2, %v366_v1  ;;  %v2065_v6 = vsub.s32 3, %v366_v1  ;;  %s240_s23 = scalar_lea.vmem %s2857_s0, %s1899_s20 }
  0x13   : > { %v2062_v5 = vld [vmem:[%s250_s19] sm:$0xff]  ;;  %v2067_v7 = vld [vmem:[%s250_s19 + $0x8] sm:$0xff]  ;;  %v2069_v8 = vsub.s32 4, %v366_v1  ;;  %v2079_v14 = vsub.s32 5, %v366_v1  ;;  %v2081_v15 = vsub.s32 6, %v366_v1  ;;  %v2087_v17 = vsub.s32 7, %v366_v1  ;;  %s2805_s26 = scalar_lea.vmem %s2860_s3, %s2889_s12 }
  0x14   : > { %vm326_vm0 = vcmp.eq.s32.totalorder %v2062_v5, 0  ;;  %vm327_vm1 = vcmp.eq.s32.totalorder %v2067_v7, 0  ;;  %v273_v24 = vld [vmem:[%s240_s23] sm:$0xff]  ;;  %v274_v25 = vld [vmem:[%s240_s23 + $0x8] sm:$0xff]  ;;  %v1902_v26 = vld [vmem:[%s240_s23 + $0x10] sm:$0xff]  ;;  %vm328_vm3 = vcmp.eq.s32.totalorder %v2062_v5, 1 }
  0x15   : > { %v748_v10 = vsel %vm326_vm0, 1.0, %v2861_v9  ;;  %v2092_v18 = vsel %vm327_vm1, 1.0, %v2861_v9  ;;  %v1903_v30 = vld [vmem:[%s240_s23 + $0x18] sm:$0xff]  ;;  %v1904_v31 = vld [vmem:[%s240_s23 + $0x20] sm:$0xff]  ;;  %v1906_v32 = vld [vmem:[%s240_s23 + $0x30] sm:$0xff]  ;;  %vm330_vm4 = vcmp.eq.s32.totalorder %v2062_v5, 2  ;;  %v284_v43 = vmax.f32 %v273_v24, %v1902_v26 }
  0x16   : > { %v755_v11 = vrot.slane %v748_v10, %v2056_v2  ;;  %v759_v12 = vrot.slane %v748_v10, %v2058_v3  ;;  %v763_v13 = vrot.slane %v748_v10, %v2060_v4  ;;  %v767_v16 = vrot.slane %v748_v10, %v2065_v6  ;;  %v1905_v36 = vld [vmem:[%s240_s23 + $0x28] sm:$0xff]  ;;  %v1907_v37 = vld [vmem:[%s240_s23 + $0x38] sm:$0xff]  ;;  %s1901_s27 = sshll.u32 %s2889_s12, 2 }
  0x17   : > { %v771_v19 = vrot.slane %v748_v10, %v2069_v8  ;;  %v775_v27 = vrot.slane %v748_v10, %v2079_v14  ;;  %v779_v28 = vrot.slane %v748_v10, %v2081_v15  ;;  %v783_v33 = vrot.slane %v748_v10, %v2087_v17  ;;  %s2814_s30 = scalar_lea.vmem %s2859_s2, %s1901_s27 }
  0x18   : > { %v832_v20 = vsel %vm445_vm2, %v755_v11, 0.0  ;;  %v833_v21 = vsel %vm445_vm2, %v759_v12, 0.0  ;;  %v835_v22 = vsel %vm445_vm2, %v763_v13, 0.0  ;;  %v837_v29 = vsel %vm445_vm2, %v767_v16, 0.0 }
  0x19   : > { %v834_v23 = vadd.f32 %v833_v21, %v832_v20  ;;  %v787_v34 = vrot.slane %v2092_v18, %v2056_v2  ;;  %vm332_vm5 = vcmp.eq.s32.totalorder %v2062_v5, 3  ;;  %v791_v38 = vrot.slane %v2092_v18, %v2058_v3 }
  0x1a   : > { %v795_v39 = vrot.slane %v2092_v18, %v2060_v4  ;;  %v799_v40 = vrot.slane %v2092_v18, %v2065_v6  ;;  %v839_v41 = vsel %vm445_vm2, %v771_v19, 0.0  ;;  %vm333_vm6 = vcmp.eq.s32.totalorder %v2067_v7, 3 }
  0x1b   : > { %v836_v35 = vadd.f32 %v835_v22, %v834_v23  ;;  %v285_v44 = vmax.f32 %v274_v25, %v1903_v30  ;;  %v286_v45 = vmax.f32 %v1904_v31, %v1906_v32  ;;  %v803_v46 = vrot.slane %v2092_v18, %v2069_v8 }
  0x1c   : > { %v841_v47 = vsel %vm445_vm2, %v775_v27, 0.0  ;;  %v843_v48 = vsel %vm445_vm2, %v779_v28, 0.0  ;;  %v287_v49 = vmax.f32 %v1905_v36, %v1907_v37  ;;  %v845_v51 = vsel %vm445_vm2, %v783_v33, 0.0 }
  0x1d   : > { %v838_v42 = vadd.f32 %v837_v29, %v836_v35  ;;  %v847_v52 = vsel %vm445_vm2, %v787_v34, 0.0  ;;  %v288_v53 = vmax.f32 %v284_v43, %v286_v45  ;;  %v849_v54 = vsel %vm445_vm2, %v791_v38, 0.0 }
  0x1e   : > { %v2125_v55 = vsel %vm328_vm3, 1.0, %v2861_v9  ;;  %v289_v56 = vmax.f32 %v285_v44, %v287_v49  ;;  %vm329_vm7 = vcmp.eq.s32.totalorder %v2067_v7, 1  ;;  %vm331_vm8 = vcmp.eq.s32.totalorder %v2067_v7, 2 }
  0x1f   : > { %v840_v50 = vadd.f32 %v839_v41, %v838_v42  ;;  %v290_v58 = vsub.f32 %v273_v24, %v288_v53  ;;  %v292_v59 = vsub.f32 %v1902_v26, %v288_v53  ;;  %v294_v60 = vsub.f32 %v1904_v31, %v288_v53 }
  0x20   : > { %v291_v61 = vsub.f32 %v274_v25, %v289_v56  ;;  %v293_v62 = vsub.f32 %v1903_v30, %v289_v56  ;;  %v295_v63 = vsub.f32 %v1905_v36, %v289_v56  ;;  %v296_v0 = vsub.f32 %v1906_v32, %v288_v53 }
  0x21   : > { %v842_v57 = vadd.f32 %v841_v47, %v840_v50  ;;  %v298_v10 = vmul.f32 1.442695, %v290_v58  ;;  %v302_v11 = vmul.f32 1.442695, %v292_v59  ;;  %v297_v12 = vsub.f32 %v1907_v37, %v289_v56 }
  0x22   : > { %v300_v13 = vmul.f32 1.442695, %v291_v61  ;;  %v304_v16 = vmul.f32 1.442695, %v293_v62  ;;  %v334_v19 = vsel %vm328_vm3, %v292_v59, %v290_v58  ;;  %v306_v21 = vmul.f32 1.442695, %v294_v60 }
  0x23   : > { %v844_v1 = vadd.f32 %v843_v48, %v842_v57  ;;  %1958 = vpow2.f32 %v298_v10  ;;  %v308_v22 = vmul.f32 1.442695, %v295_v63  ;;  %v310_v23 = vmul.f32 1.442695, %v296_v0 }
  0x24   : > { %1960 = vpow2.f32 %v300_v13  ;;  %v336_v24 = vsel %vm330_vm4, %v294_v60, %v334_v19  ;;  %v335_v25 = vsel %vm329_vm7, %v293_v62, %v291_v61  ;;  %v851_v29 = vsel %vm445_vm2, %v795_v39, 0.0 }
  0x25   : > { %v846_v20 = vadd.f32 %v845_v51, %v844_v1  ;;  %1962 = vpow2.f32 %v302_v11  ;;  %v2137_v27 = vsel %vm332_vm5, %v296_v0, %v336_v24  ;;  %v337_v28 = vsel %vm331_vm8, %v295_v63, %v335_v25 }
  0x26   : > { %1964 = vpow2.f32 %v304_v16  ;;  %v312_v30 = vmul.f32 1.442695, %v297_v12  ;;  %v2144_v31 = vsel %vm333_vm6, %v297_v12, %v337_v28  ;;  %v807_v32 = vrot.slane %v2092_v18, %v2079_v14 }
  0x27   : > { %v848_v26 = vadd.f32 %v847_v52, %v846_v20  ;;  %1966 = vpow2.f32 %v306_v21  ;;  %v853_v34 = vsel %vm445_vm2, %v799_v40, 0.0  ;;  %v1140_v35 = vrot.slane %v2125_v55, %v2056_v2 }
  0x28   : > { %1968 = vpow2.f32 %v308_v22  ;;  %v1144_v36 = vrot.slane %v2125_v55, %v2058_v3  ;;  %v1148_v38 = vrot.slane %v2125_v55, %v2060_v4  ;;  %v811_v39 = vrot.slane %v2092_v18, %v2081_v15 }
  0x29   : > { %v850_v33 = vadd.f32 %v849_v54, %v848_v26  ;;  %1970 = vpow2.f32 %v310_v23  ;;  %v855_v41 = vsel %vm445_vm2, %v803_v46, 0.0  ;;  %v1152_v40 = vrot.slane %v2125_v55, %v2065_v6 }
  0x2a   : > { %1972 = vpow2.f32 %v312_v30  ;;  %v815_v42 = vrot.slane %v2092_v18, %v2087_v17  ;;  %v857_v44 = vsel %vm445_vm2, %v807_v32, 0.0  ;;  %v1156_v45 = vrot.slane %v2125_v55, %v2069_v8 }
  0x2b   : > { %v852_v37 = vadd.f32 %v851_v29, %v850_v33  ;;  %v1217_v47 = vsel %vm445_vm2, %v1140_v35, 0.0  ;;  %v1218_v48 = vsel %vm445_vm2, %v1144_v36, 0.0  ;;  %v1220_v51 = vsel %vm445_vm2, %v1148_v38, 0.0 }
  0x2c   : > { %v1219_v50 = vadd.f32 %v1218_v48, %v1217_v47  ;;  %v859_v18 = vsel %vm445_vm2, %v811_v39, 0.0  ;;  %v1160_v53 = vrot.slane %v2125_v55, %v2079_v14  ;;  %v1222_v54 = vsel %vm445_vm2, %v1152_v40, 0.0 }
  0x2d   : > { %v854_v43 = vadd.f32 %v853_v34, %v852_v37  ;;  %v2167_v49 = vpop.eup %1958  ;;  %v861_v60 = vsel %vm445_vm2, %v815_v42, 0.0  ;;  %v1164_v61 = vrot.slane %v2125_v55, %v2081_v15  ;;  %v1224_v62 = vsel %vm445_vm2, %v1156_v45, 0.0 }
  0x2e   : > { %v2170_v52 = vpop.eup %1960  ;;  %v1221_v58 = vadd.f32 %v1220_v51, %v1219_v50  ;;  %v1134_v1 = vsel %vm329_vm7, 1.0, %v2861_v9  ;;  %v1168_v13 = vrot.slane %v2125_v55, %v2087_v17  ;;  %v1226_v16 = vsel %vm445_vm2, %v1160_v53, 0.0 }
  0x2f   : > { %v856_v46 = vadd.f32 %v855_v41, %v854_v43  ;;  %v2176_v56 = vpop.eup %1962  ;;  %v1172_v25 = vrot.slane %v1134_v1, %v2056_v2  ;;  %v1228_v26 = vsel %vm445_vm2, %v1164_v61, 0.0  ;;  %v2011_v30 = vmov 0.01  }
  0x30   : > { %v2178_v59 = vpop.eup %1964  ;;  %v1223_v10 = vadd.f32 %v1222_v54, %v1221_v58  ;;  %v314_v12 = vadd.f32 %v2176_v56, %v2167_v49  ;;  %v340_v32 = vsel %vm328_vm3, 4.0, %v2011_v30  ;;  %v1176_v33 = vrot.slane %v1134_v1, %v2058_v3 }
  0x31   : > { %v858_v57 = vadd.f32 %v857_v44, %v856_v46  ;;  %v2184_v63 = vpop.eup %1966  ;;  %v315_v23 = vadd.f32 %v2178_v59, %v2170_v52  ;;  %v1230_v34 = vsel %vm445_vm2, %v1168_v13, 0.0  ;;  %v341_v35 = vsel %vm329_vm7, 4.0, %v2011_v30 }
  0x32   : > { %v2189_v11 = vpop.eup %1968  ;;  %v1225_v21 = vadd.f32 %v1224_v62, %v1223_v10  ;;  %v1180_v38 = vrot.slane %v1134_v1, %v2060_v4  ;;  %v1232_v39 = vsel %vm445_vm2, %v1172_v25, 0.0  ;;  %v2221_v41 = vsel %vm330_vm4, 1.0, %v2861_v9 }
  0x33   : > { %v860_v0 = vadd.f32 %v859_v18, %v858_v57  ;;  %v2196_v19 = vpop.eup %1970  ;;  %v342_v40 = vsel %vm330_vm4, 1.8, %v340_v32  ;;  %v1184_v42 = vrot.slane %v1134_v1, %v2065_v6  ;;  %v1188_v44 = vrot.slane %v1134_v1, %v2069_v8 }
  0x34   : > { %v2198_v22 = vpop.eup %1972  ;;  %v316_v24 = vadd.f32 %v2196_v19, %v2184_v63  ;;  %v1227_v28 = vadd.f32 %v1226_v16, %v1225_v21  ;;  %v1192_v45 = vrot.slane %v1134_v1, %v2079_v14  ;;  %v1234_v47 = vsel %vm445_vm2, %v1176_v33, 0.0 }
  0x35   : > { %v862_v20 = vadd.f32 %v861_v60, %v860_v0  ;;  %2866 = vst [vmem:[#allocation2_spill] sm:$0xff] %v2198_v22  ;;  %v317_v55 = vadd.f32 %v2198_v22, %v2189_v11  ;;  %v343_v48 = vsel %vm331_vm8, 1.8, %v341_v35  ;;  %v1196_v46 = vrot.slane %v1134_v1, %v2081_v15 }
  0x36   : > { %v318_v29 = vadd.f32 %v316_v24, %v314_v12  ;;  %v1229_v36 = vadd.f32 %v1228_v26, %v1227_v28  ;;  %v1200_v50 = vrot.slane %v1134_v1, %v2087_v17  ;;  %v1236_v18 = vsel %vm445_vm2, %v1180_v38, 0.0 }
  0x37   : > { %863 = vadd.xlane.f32.xlu1 %v862_v20  ;;  %v2214_v37 = vadd.f32 %v317_v55, %v315_v23  ;;  %v2237_v53 = vsel %vm332_vm5, 6.0, %v342_v40  ;;  %v1524_v57 = vrot.slane %v2221_v41, %v2056_v2  ;;  %v1528_v58 = vrot.slane %v2221_v41, %v2058_v3 }
  0x38   : > { %1974 = vrcp.f32 %v318_v29  ;;  %v1231_v43 = vadd.f32 %v1230_v34, %v1229_v36  ;;  %v2245_v60 = vsel %vm333_vm6, 6.0, %v343_v48  ;;  %v1238_v61 = vsel %vm445_vm2, %v1184_v42, 0.0 }
  0x39   : > { %1976 = vrcp.f32 %v2214_v37  ;;  %v1240_v62 = vsel %vm445_vm2, %v1188_v44, 0.0  ;;  %v2250_v0 = vsel %vm445_vm2, %v1192_v45, 0.0  ;;  %v2253_v10 = vsel %vm445_vm2, %v1196_v46, 0.0 }
  0x3a   : > { %v1233_v51 = vadd.f32 %v1232_v39, %v1231_v43  ;;  %1978 = vlog2.f32 %v318_v29  ;;  %v2256_v12 = vsel %vm445_vm2, %v1200_v50, 0.0  ;;  %v2261_v13 = vsel %vm331_vm8, 1.0, %v2861_v9 }
  0x3b   : > { %v1532_v16 = vrot.slane %v2221_v41, %v2060_v4  ;;  %v1536_v20 = vrot.slane %v2221_v41, %v2065_v6  ;;  %v1540_v21 = vrot.slane %v2221_v41, %v2069_v8  ;;  %v1544_v23 = vrot.slane %v2221_v41, %v2079_v14 }
  0x3c   : > { %v1235_v54 = vadd.f32 %v1234_v47, %v1233_v51  ;;  %v1548_v25 = vrot.slane %v2221_v41, %v2081_v15  ;;  %v1601_v26 = vsel %vm445_vm2, %v1524_v57, 0.0  ;;  %v1602_v55 = vsel %vm445_vm2, %v1528_v58, 0.0 }
  0x3d   : > { %v1552_v29 = vrot.slane %v2221_v41, %v2087_v17  ;;  %v1556_v30 = vrot.slane %v2261_v13, %v2056_v2  ;;  %v1560_v32 = vrot.slane %v2261_v13, %v2058_v3  ;;  %v1564_v33 = vrot.slane %v2261_v13, %v2060_v4 }
  0x3e   : > { %v1237_v1 = vadd.f32 %v1236_v18, %v1235_v54  ;;  %v1604_v44 = vsel %vm445_vm2, %v1532_v16, 0.0  ;;  %v2319_v50 = vsel %vm445_vm2, %v1536_v20, 0.0  ;;  %1980 = vlog2.f32 %v2214_v37 }
  0x3f   : > { %v2343_v16 = vsel %vm445_vm2, %v1548_v25, 0.0  ;;  %v2346_v37 = vsel %vm445_vm2, %v1552_v29, 0.0  ;;  %v2350_v20 = vsel %vm445_vm2, %v1556_v30, 0.0 }
  0x40   : > { %v1239_v24 = vadd.f32 %v1238_v61, %v1237_v1  ;;  %v2334_v61 = vsel %vm445_vm2, %v1540_v21, 0.0  ;;  %2869 = vst [vmem:[#allocation5_spill] sm:$0xff] %v2350_v20  ;;  %v2353_v21 = vsel %vm445_vm2, %v1560_v32, 0.0 }
  0x41   : > { %2870 = vst [vmem:[#allocation6_spill] sm:$0xff] %v2353_v21 }
  0x42   : > { %v1975_v28 = vpop.eup %1974  ;;  %v2294_v41 = vadd.f32 %v1240_v62, %v1239_v24  ;;  %v2337_v62 = vsel %vm445_vm2, %v1544_v23, 0.0  ;;  %v2356_v23 = vsel %vm445_vm2, %v1564_v33, 0.0 }
  0x43   : > { %v2284_v34 = vmul.f32 %v1975_v28, %v2167_v49  ;;  %v2287_v35 = vmul.f32 %v1975_v28, %v2184_v63  ;;  %v1644_v36 = vmul.f32 %v1975_v28, %v2196_v19  ;;  %v2292_v39 = vpop.eup %1976  ;;  %v1603_v49 = vadd.f32 %v1602_v55, %v1601_v26  ;;  %2871 = vst [vmem:[#allocation7_spill] sm:$0xff] %v2356_v23 }
  0x44   : > { %2867 = vst [vmem:[#allocation3_spill] sm:$0xff] %v2292_v39  ;;  %v1979_v45 = vpop.eup %1978  ;;  %v2323_v51 = vmul.f32 %v2292_v39, %v2170_v52  ;;  %v2329_v57 = vmul.f32 %v1975_v28, %v2176_v56  ;;  %v2371_v30 = vmul.f32 %v2292_v39, %v2178_v59  ;;  %v2375_v32 = vmul.f32 %v2292_v39, %v2189_v11 }
  0x45   : > { %v493_v63 = vsel %vm326_vm0, %v2284_v34, 0.0  ;;  %v2306_v19 = vsel %vm330_vm4, %v2287_v35, 0.0  ;;  %v2313_v47 = vsel %vm332_vm5, %v1644_v36, 0.0  ;;  %v2331_v58 = vadd.f32 %v1604_v44, %v1603_v49 }
  0x46   : > { %2868 = vst [vmem:[#allocation4_spill] sm:$0xff] %v2313_v47  ;;  %v500_v48 = vrot.slane %v493_v63, %v2056_v2  ;;  %v504_v18 = vrot.slane %v493_v63, %v2058_v3  ;;  %v508_v54 = vrot.slane %v493_v63, %v2060_v4  ;;  %v2339_v1 = vmul.f32 0.6931472, %v1979_v45 }
  0x47   : > { %v512_v52 = vrot.slane %v493_v63, %v2065_v6  ;;  %v494_v24 = vsel %vm327_vm1, %v2323_v51, 0.0  ;;  %v516_v25 = vrot.slane %v493_v63, %v2069_v8  ;;  %v2367_v28 = vsel %vm328_vm3, %v2329_v57, 0.0 }
  0x48   : > { %v577_v56 = vsel %vm445_vm2, %v500_v48, 0.0  ;;  %v578_v26 = vsel %vm445_vm2, %v504_v18, 0.0  ;;  %v580_v55 = vsel %vm445_vm2, %v508_v54, 0.0  ;;  %v346_v33 = vsub.f32 %v2339_v1, %v2137_v27 }
  0x49   : > { %v579_v29 = vadd.f32 %v578_v26, %v577_v56  ;;  %v520_v36 = vrot.slane %v493_v63, %v2079_v14  ;;  %v524_v49 = vrot.slane %v493_v63, %v2081_v15  ;;  %v582_v5 = vsel %vm445_vm2, %v512_v52, 0.0  ;;  %v2395_v26 = vpop.eup %1980 }
  0x4a   : > { %v528_v44 = vrot.slane %v493_v63, %v2087_v17  ;;  %v532_v45 = vrot.slane %v494_v24, %v2056_v2  ;;  %v536_v59 = vrot.slane %v494_v24, %v2058_v3  ;;  %v540_v18 = vrot.slane %v494_v24, %v2060_v4 }
  0x4b   : > { %v581_v48 = vadd.f32 %v580_v55, %v579_v29  ;;  %v544_v11 = vrot.slane %v494_v24, %v2065_v6  ;;  %v584_v54 = vsel %vm445_vm2, %v516_v25, 0.0  ;;  %v626_v27 = vrot.slane %v2284_v34, %v2056_v2 }
  0x4c   : > { %v548_v1 = vrot.slane %v494_v24, %v2069_v8  ;;  %v630_v63 = vrot.slane %v2284_v34, %v2058_v3  ;;  %v634_v52 = vrot.slane %v2284_v34, %v2060_v4  ;;  %v552_v55 = vrot.slane %v494_v24, %v2079_v14 }
  0x4d   : > { %v583_v56 = vadd.f32 %v582_v5, %v581_v48  ;;  %v556_v29 = vrot.slane %v494_v24, %v2081_v15  ;;  %v560_v25 = vrot.slane %v494_v24, %v2087_v17  ;;  %v586_v9 = vsel %vm445_vm2, %v520_v36, 0.0 }
  0x4e   : > { %v588_v43 = vsel %vm445_vm2, %v524_v49, 0.0  ;;  %v590_v5 = vsel %vm445_vm2, %v528_v44, 0.0  ;;  %v638_v48 = vrot.slane %v2284_v34, %v2065_v6  ;;  %v592_v42 = vsel %vm445_vm2, %v532_v45, 0.0 }
  0x4f   : > { %v585_v46 = vadd.f32 %v584_v54, %v583_v56  ;;  %v594_v40 = vsel %vm445_vm2, %v536_v59, 0.0  ;;  %v596_v38 = vsel %vm445_vm2, %v540_v18, 0.0  ;;  %v703_v23 = vsel %vm445_vm2, %v626_v27, 0.0 }
  0x50   : > { %v642_v24 = vrot.slane %v2284_v34, %v2069_v8  ;;  %v704_v36 = vsel %vm445_vm2, %v630_v63, 0.0  ;;  %v706_v49 = vsel %vm445_vm2, %v634_v52, 0.0  ;;  %v598_v44 = vsel %vm445_vm2, %v544_v11, 0.0 }
  0x51   : > { %v587_v39 = vadd.f32 %v586_v9, %v585_v46  ;;  %v600_v54 = vsel %vm445_vm2, %v548_v1, 0.0  ;;  %v602_v45 = vsel %vm445_vm2, %v552_v55, 0.0  ;;  %v705_v56 = vadd.f32 %v704_v36, %v703_v23 }
  0x52   : > { %v2417_v18 = vsel %vm445_vm2, %v556_v29, 0.0  ;;  %v646_v9 = vrot.slane %v2284_v34, %v2079_v14  ;;  %v708_v46 = vsel %vm445_vm2, %v638_v48, 0.0  ;;  %v2423_v27 = vsel %vm445_vm2, %v560_v25, 0.0 }
  0x53   : > { %v589_v59 = vadd.f32 %v588_v43, %v587_v39  ;;  %v650_v11 = vrot.slane %v2284_v34, %v2081_v15  ;;  %v654_v1 = vrot.slane %v2284_v34, %v2087_v17  ;;  %v707_v63 = vadd.f32 %v706_v49, %v705_v56 }
  0x54   : > { %v658_v39 = vrot.slane %v2323_v51, %v2056_v2  ;;  %v662_v43 = vrot.slane %v2323_v51, %v2058_v3  ;;  %v710_v52 = vsel %vm445_vm2, %v642_v24, 0.0  ;;  %v666_v55 = vrot.slane %v2323_v51, %v2060_v4 }
  0x55   : > { %v591_v23 = vadd.f32 %v590_v5, %v589_v59  ;;  %v670_v29 = vrot.slane %v2323_v51, %v2065_v6  ;;  %v709_v25 = vadd.f32 %v708_v46, %v707_v63  ;;  %v2439_v48 = vmul.f32 %v346_v33, %v2237_v53 }
  0x56   : > { %v674_v5 = vrot.slane %v2323_v51, %v2069_v8  ;;  %v678_v36 = vrot.slane %v2323_v51, %v2079_v14  ;;  %v712_v49 = vsel %vm445_vm2, %v646_v9, 0.0  ;;  %v682_v24 = vrot.slane %v2323_v51, %v2081_v15 }
  0x57   : > { %v593_v34 = vadd.f32 %v592_v42, %v591_v23  ;;  %v711_v56 = vadd.f32 %v710_v52, %v709_v25  ;;  %v714_v59 = vsel %vm445_vm2, %v650_v11, 0.0  ;;  %v350_v46 = vsub.f32 0.0, %v2439_v48 }
  0x58   : > { %v886_v53 = vrot.slane %v2367_v28, %v2056_v2  ;;  %v890_v42 = vrot.slane %v2367_v28, %v2058_v3  ;;  %v894_v33 = vrot.slane %v2367_v28, %v2060_v4  ;;  %v686_v9 = vrot.slane %v2323_v51, %v2087_v17 }
  0x59   : > { %v595_v63 = vadd.f32 %v594_v40, %v593_v34  ;;  %v713_v23 = vadd.f32 %v712_v49, %v711_v56  ;;  %v716_v52 = vsel %vm445_vm2, %v654_v1, 0.0  ;;  %v718_v11 = vsel %vm445_vm2, %v658_v39, 0.0 }
  0x5a   : > { %v720_v40 = vsel %vm445_vm2, %v662_v43, 0.0  ;;  %v722_v34 = vsel %vm445_vm2, %v666_v55, 0.0  ;;  %v898_v22 = vrot.slane %v2367_v28, %v2065_v6  ;;  %v724_v20 = vsel %vm445_vm2, %v670_v29, 0.0 }
  0x5b   : > { %v597_v25 = vadd.f32 %v596_v38, %v595_v63  ;;  %v715_v21 = vadd.f32 %v714_v59, %v713_v23  ;;  %v352_v47 = vmul.f32 1.442695, %v350_v46  ;;  %v902_v51 = vrot.slane %v2367_v28, %v2069_v8 }
  0x5c   : > { %v963_v1 = vsel %vm445_vm2, %v886_v53, 0.0  ;;  %v964_v39 = vsel %vm445_vm2, %v890_v42, 0.0  ;;  %v966_v38 = vsel %vm445_vm2, %v894_v33, 0.0  ;;  %v726_v55 = vsel %vm445_vm2, %v674_v5, 0.0 }
  0x5d   : > { %v599_v49 = vadd.f32 %v598_v44, %v597_v25  ;;  %v717_v43 = vadd.f32 %v716_v52, %v715_v21  ;;  %v728_v56 = vsel %vm445_vm2, %v678_v36, 0.0  ;;  %v965_v63 = vadd.f32 %v964_v39, %v963_v1 }
  0x5e   : > { %v880_v29 = vsel %vm329_vm7, %v2371_v30, 0.0  ;;  %v906_v44 = vrot.slane %v2367_v28, %v2079_v14  ;;  %v968_v46 = vsel %vm445_vm2, %v898_v22, 0.0  ;;  %v730_v42 = vsel %vm445_vm2, %v682_v24, 0.0 }
  0x5f   : > { %v601_v59 = vadd.f32 %v600_v54, %v599_v49  ;;  %v719_v53 = vadd.f32 %v718_v11, %v717_v43  ;;  %1982 = vpow2.f32 %v352_v47  ;;  %v967_v21 = vadd.f32 %v966_v38, %v965_v63 }
  0x60   : > { %v732_v5 = vsel %vm445_vm2, %v686_v9, 0.0  ;;  %v910_v54 = vrot.slane %v2367_v28, %v2081_v15  ;;  %v970_v36 = vsel %vm445_vm2, %v902_v51, 0.0  ;;  %v914_v52 = vrot.slane %v2367_v28, %v2087_v17 }
  0x61   : > { %v603_v33 = vadd.f32 %v602_v45, %v601_v59  ;;  %v721_v23 = vadd.f32 %v720_v40, %v719_v53  ;;  %v918_v25 = vrot.slane %v880_v29, %v2056_v2  ;;  %v969_v22 = vadd.f32 %v968_v46, %v967_v21 }
  0x62   : > { %v922_v47 = vrot.slane %v880_v29, %v2058_v3  ;;  %v926_v45 = vrot.slane %v880_v29, %v2060_v4  ;;  %v972_v24 = vsel %vm445_vm2, %v906_v44, 0.0  ;;  %v930_v49 = vrot.slane %v880_v29, %v2065_v6 }
  0x63   : > { %v605_v11 = vadd.f32 %v2417_v18, %v603_v33  ;;  %v723_v9 = vadd.f32 %v722_v34, %v721_v23  ;;  %v934_v51 = vrot.slane %v880_v29, %v2069_v8  ;;  %v971_v40 = vadd.f32 %v970_v36, %v969_v22 }
  0x64   : > { %v938_v28 = vrot.slane %v880_v29, %v2079_v14  ;;  %v974_v39 = vsel %vm445_vm2, %v910_v54, 0.0  ;;  %v1012_v18 = vrot.slane %v2329_v57, %v2056_v2  ;;  %v1016_v63 = vrot.slane %v2329_v57, %v2058_v3 }
  0x65   : > { %v607_v1 = vadd.f32 %v2423_v27, %v605_v11  ;;  %v725_v38 = vadd.f32 %v724_v20, %v723_v9  ;;  %v973_v43 = vadd.f32 %v972_v24, %v971_v40  ;;  %v1020_v34 = vrot.slane %v2329_v57, %v2060_v4 }
  0x66   : > { %v942_v59 = vrot.slane %v880_v29, %v2081_v15  ;;  %v946_v27 = vrot.slane %v880_v29, %v2087_v17  ;;  %v976_v44 = vsel %vm445_vm2, %v914_v52, 0.0  ;;  %v978_v46 = vsel %vm445_vm2, %v918_v25, 0.0 }
  0x67   : > { %608 = vadd.xlane.f32.xlu0 %v607_v1  ;;  %v727_v53 = vadd.f32 %v726_v55, %v725_v38  ;;  %v975_v21 = vadd.f32 %v974_v39, %v973_v43  ;;  %v980_v20 = vsel %vm445_vm2, %v922_v47, 0.0  ;;  %v1024_v33 = vrot.slane %v2329_v57, %v2065_v6 }
  0x68   : > { %v982_v54 = vsel %vm445_vm2, %v926_v45, 0.0  ;;  %v984_v36 = vsel %vm445_vm2, %v930_v49, 0.0  ;;  %v1028_v23 = vrot.slane %v2329_v57, %v2069_v8  ;;  %v1089_v29 = vsel %vm445_vm2, %v1012_v18, 0.0 }
  0x69   : > { %v1983_v22 = vpop.eup %1982  ;;  %v729_v52 = vadd.f32 %v728_v56, %v727_v53  ;;  %v977_v11 = vadd.f32 %v976_v44, %v975_v21  ;;  %v1090_v55 = vsel %vm445_vm2, %v1016_v63, 0.0  ;;  %v1092_v25 = vsel %vm445_vm2, %v1020_v34, 0.0 }
  0x6a   : > { %v986_v47 = vsel %vm445_vm2, %v934_v51, 0.0  ;;  %v988_v24 = vsel %vm445_vm2, %v938_v28, 0.0  ;;  %v990_v45 = vsel %vm445_vm2, %v942_v59, 0.0  ;;  %v1091_v9 = vadd.f32 %v1090_v55, %v1089_v29 }
  0x6b   : > { %v731_v49 = vadd.f32 %v730_v42, %v729_v52  ;;  %v979_v40 = vadd.f32 %v978_v46, %v977_v11  ;;  %v1032_v1 = vrot.slane %v2329_v57, %v2079_v14  ;;  %v1094_v39 = vsel %vm445_vm2, %v1024_v33, 0.0 }
  0x6c   : > { %v356_v56 = vsub.f32 1.0, %v1983_v22  ;;  %v992_v18 = vsel %vm445_vm2, %v946_v27, 0.0  ;;  %v1036_v38 = vrot.slane %v2329_v57, %v2081_v15  ;;  %v1093_v43 = vadd.f32 %v1092_v25, %v1091_v9 }
  0x6d   : > { %v733_v51 = vadd.f32 %v732_v5, %v731_v49  ;;  %v981_v63 = vadd.f32 %v980_v20, %v979_v40  ;;  %v1040_v28 = vrot.slane %v2329_v57, %v2087_v17  ;;  %v1096_v42 = vsel %vm445_vm2, %v1028_v23, 0.0 }
  0x6e   : > { %v1044_v34 = vrot.slane %v2371_v30, %v2056_v2  ;;  %v1048_v59 = vrot.slane %v2371_v30, %v2058_v3  ;;  %v1052_v27 = vrot.slane %v2371_v30, %v2060_v4  ;;  %v1095_v44 = vadd.f32 %v1094_v39, %v1093_v43 }
  0x6f   : > { %734 = vadd.xlane.f32.xlu1 %v733_v51  ;;  %v983_v46 = vadd.f32 %v982_v54, %v981_v63  ;;  %v1098_v5 = vsel %vm445_vm2, %v1032_v1, 0.0  ;;  %v325_v53 = vmul.f32 0.6931472, %v2395_v26  ;;  %v2538_v57 = vsel %vm331_vm8, %v2375_v32, 0.0 }
  0x70   : > { %v358_v21 = vmul.f32 %v356_v56, %v356_v56  ;;  %v1056_v20 = vrot.slane %v2371_v30, %v2065_v6  ;;  %v1060_v33 = vrot.slane %v2371_v30, %v2069_v8  ;;  %v1097_v23 = vadd.f32 %v1096_v42, %v1095_v44 }
  0x71   : > { %v985_v29 = vadd.f32 %v984_v36, %v983_v46  ;;  %v1064_v54 = vrot.slane %v2371_v30, %v2079_v14  ;;  %v1100_v22 = vsel %vm445_vm2, %v1036_v38, 0.0  ;;  %v347_v26 = vsub.f32 %v325_v53, %v2144_v31 }
  0x72   : > { %v1068_v52 = vrot.slane %v2371_v30, %v2081_v15  ;;  %v1099_v11 = vadd.f32 %v1098_v5, %v1097_v23  ;;  %v1270_v55 = vrot.slane %v2306_v19, %v2056_v2  ;;  %v1274_v25 = vrot.slane %v2306_v19, %v2058_v3 }
  0x73   : > { %v987_v9 = vadd.f32 %v986_v47, %v985_v29  ;;  %v1102_v36 = vsel %vm445_vm2, %v1040_v28, 0.0  ;;  %v2556_v49 = vmul.f32 %v347_v26, %v2245_v60  ;;  %v1278_v40 = vrot.slane %v2306_v19, %v2060_v4 }
  0x74   : > { %v2561_v31 = vmul.f32 %v358_v21, %v2439_v48  ;;  %v1072_v1 = vrot.slane %v2371_v30, %v2087_v17  ;;  %v1101_v39 = vadd.f32 %v1100_v22, %v1099_v11  ;;  %v1282_v56 = vrot.slane %v2306_v19, %v2065_v6 }
  0x75   : > { %v989_v38 = vadd.f32 %v988_v24, %v987_v9  ;;  %v1104_v47 = vsel %vm445_vm2, %v1044_v34, 0.0  ;;  %v1106_v43 = vsel %vm445_vm2, %v1048_v59, 0.0  ;;  %v351_v60 = vsub.f32 0.0, %v2556_v49 }
  0x76   : > { %v1103_v51 = vadd.f32 %v1102_v36, %v1101_v39  ;;  %v1286_v63 = vrot.slane %v2306_v19, %v2069_v8  ;;  %v1347_v48 = vsel %vm445_vm2, %v1270_v55, 0.0  ;;  %v1348_v28 = vsel %vm445_vm2, %v1274_v25, 0.0 }
  0x77   : > { %v991_v30 = vadd.f32 %v990_v45, %v989_v38  ;;  %v354_v42 = vmul.f32 1.442695, %v351_v60  ;;  %v1349_v44 = vadd.f32 %v1348_v28, %v1347_v48  ;;  %v1350_v46 = vsel %vm445_vm2, %v1278_v40, 0.0 }
  0x78   : > { %v1105_v24 = vadd.f32 %v1104_v47, %v1103_v51  ;;  %v1108_v34 = vsel %vm445_vm2, %v1052_v27, 0.0  ;;  %v1290_v59 = vrot.slane %v2306_v19, %v2079_v14  ;;  %v1352_v5 = vsel %vm445_vm2, %v1282_v56, 0.0 }
  0x79   : > { %v993_v53 = vadd.f32 %v992_v18, %v991_v30  ;;  %v1110_v21 = vsel %vm445_vm2, %v1056_v20, 0.0  ;;  %1984 = vpow2.f32 %v354_v42  ;;  %v1351_v23 = vadd.f32 %v1350_v46, %v1349_v44 }
  0x7a   : > { %v1107_v29 = vadd.f32 %v1106_v43, %v1105_v24  ;;  %v1112_v45 = vsel %vm445_vm2, %v1060_v33, 0.0  ;;  %v1294_v22 = vrot.slane %v2306_v19, %v2081_v15  ;;  %v1354_v26 = vsel %vm445_vm2, %v1286_v63, 0.0 }
  0x7b   : > { %994 = vadd.xlane.f32.xlu0 %v993_v53  ;;  %v1114_v27 = vsel %vm445_vm2, %v1064_v54, 0.0  ;;  %v1116_v11 = vsel %vm445_vm2, %v1068_v52, 0.0  ;;  %v1298_v18 = vrot.slane %v2306_v19, %v2087_v17  ;;  %v1353_v55 = vadd.f32 %v1352_v5, %v1351_v23 }
  0x7c   : > { %v1109_v20 = vadd.f32 %v1108_v34, %v1107_v29  ;;  %v1118_v25 = vsel %vm445_vm2, %v1072_v1, 0.0  ;;  %v1302_v33 = vrot.slane %v2538_v57, %v2056_v2  ;;  %v1356_v9 = vsel %vm445_vm2, %v1290_v59, 0.0 }
  0x7d   : > { %v1355_v36 = vadd.f32 %v1354_v26, %v1353_v55  ;;  %v368_v40 = vrot.slane %v2561_v31, %v2056_v2  ;;  %v372_v54 = vrot.slane %v2561_v31, %v2058_v3  ;;  %v376_v52 = vrot.slane %v2561_v31, %v2060_v4 }
  0x7e   : > { %v1111_v19 = vadd.f32 %v1110_v21, %v1109_v20  ;;  %v1306_v39 = vrot.slane %v2538_v57, %v2058_v3  ;;  %v1358_v1 = vsel %vm445_vm2, %v1294_v22, 0.0  ;;  %v380_v56 = vrot.slane %v2561_v31, %v2065_v6 }
  0x7f   : > { %v1310_v38 = vrot.slane %v2538_v57, %v2060_v4  ;;  %v1357_v47 = vadd.f32 %v1356_v9, %v1355_v36  ;;  %v1360_v43 = vsel %vm445_vm2, %v1298_v18, 0.0  ;;  %v446_v60 = vsel %vm445_vm2, %v368_v40, 0.0 }
  0x80   : > { %v1113_v51 = vadd.f32 %v1112_v45, %v1111_v19  ;;  %v384_v63 = vrot.slane %v2561_v31, %v2069_v8  ;;  %v447_v48 = vsel %vm445_vm2, %v372_v54, 0.0  ;;  %v449_v28 = vsel %vm445_vm2, %v376_v52, 0.0 }
  0x81   : > { %v1314_v30 = vrot.slane %v2538_v57, %v2065_v6  ;;  %v1359_v42 = vadd.f32 %v1358_v1, %v1357_v47  ;;  %v1362_v44 = vsel %vm445_vm2, %v1302_v33, 0.0  ;;  %v448_v46 = vadd.f32 %v447_v48, %v446_v60 }
  0x82   : > { %v1115_v24 = vadd.f32 %v1114_v27, %v1113_v51  ;;  %v388_v34 = vrot.slane %v2561_v31, %v2079_v14  ;;  %v451_v59 = vsel %vm445_vm2, %v380_v56, 0.0  ;;  %v1243_v5 = vadd.f32 %v2250_v0, %v2294_v41 }
  0x83   : > { %v1985_v53 = vpop.eup %1984  ;;  %v1318_v21 = vrot.slane %v2538_v57, %v2069_v8  ;;  %v1361_v23 = vadd.f32 %v1360_v43, %v1359_v42  ;;  %v1364_v29 = vsel %vm445_vm2, %v1306_v39, 0.0  ;;  %v450_v45 = vadd.f32 %v449_v28, %v448_v46 }
  0x84   : > { %v1117_v22 = vadd.f32 %v1116_v11, %v1115_v24  ;;  %v357_v26 = vsub.f32 1.0, %v1985_v53  ;;  %v453_v27 = vsel %vm445_vm2, %v384_v63, 0.0  ;;  %v1245_v18 = vadd.f32 %v2253_v10, %v1243_v5 }
  0x85   : > { %v1363_v55 = vadd.f32 %v1362_v44, %v1361_v23  ;;  %v1366_v20 = vsel %vm445_vm2, %v1310_v38, 0.0  ;;  %v392_v0 = vrot.slane %v2561_v31, %v2081_v15  ;;  %v452_v41 = vadd.f32 %v451_v59, %v450_v45 }
  0x86   : > { %v1119_v33 = vadd.f32 %v1118_v25, %v1117_v22  ;;  %v359_v9 = vmul.f32 %v357_v26, %v357_v26  ;;  %v455_v36 = vsel %vm445_vm2, %v388_v34, 0.0  ;;  %v2629_v40 = vadd.f32 %v2256_v12, %v1245_v18 }
  0x87   : > { %v1322_v11 = vrot.slane %v2538_v57, %v2079_v14  ;;  %v1365_v54 = vadd.f32 %v1364_v29, %v1363_v55  ;;  %v396_v10 = vrot.slane %v2561_v31, %v2087_v17  ;;  %v454_v52 = vadd.f32 %v453_v27, %v452_v41 }
  0x88   : > { %1120 = vadd.xlane.f32.xlu1 %v1119_v33  ;;  %v2636_v19 = vmul.f32 %v359_v9, %v2556_v49  ;;  %v1368_v25 = vsel %vm445_vm2, %v1314_v30, 0.0  ;;  %v1607_v39 = vadd.f32 %v2319_v50, %v2331_v58  ;;  %v2872_v12 = vrot.slane %v2261_v13, %v2065_v6 }
  0x89   : > { %v1367_v56 = vadd.f32 %v1366_v20, %v1365_v54  ;;  %v456_v38 = vadd.f32 %v455_v36, %v454_v52  ;;  %v457_v31 = vsel %vm445_vm2, %v392_v0, 0.0  ;;  %v2873_v47 = vrot.slane %v2261_v13, %v2069_v8 }
  0x8a   : > { %v2645_v1 = vsel %vm445_vm2, %v2872_v12, 0.0  ;;  %v1326_v43 = vrot.slane %v2538_v57, %v2081_v15  ;;  %v1330_v50 = vrot.slane %v2538_v57, %v2087_v17  ;;  %v1370_v58 = vsel %vm445_vm2, %v1318_v21, 0.0 }
  0x8b   : > { %v2652_v49 = vsel %vm445_vm2, %v2873_v47, 0.0  ;;  %v400_v60 = vrot.slane %v2636_v19, %v2056_v2  ;;  %v1369_v51 = vadd.f32 %v1368_v25, %v1367_v56  ;;  %v1372_v63 = vsel %vm445_vm2, %v1322_v11, 0.0 }
  0x8c   : > { %v404_v48 = vrot.slane %v2636_v19, %v2058_v3  ;;  %v459_v28 = vsel %vm445_vm2, %v396_v10, 0.0  ;;  %v458_v30 = vadd.f32 %v457_v31, %v456_v38  ;;  %v1396_v42 = vrot.slane %v2287_v35, %v2056_v2 }
  0x8d   : > { %v1400_v57 = vrot.slane %v2287_v35, %v2058_v3  ;;  %v1404_v44 = vrot.slane %v2287_v35, %v2060_v4  ;;  %v1371_v46 = vadd.f32 %v1370_v58, %v1369_v51  ;;  %v408_v24 = vrot.slane %v2636_v19, %v2060_v4 }
  0x8e   : > { %v461_v34 = vsel %vm445_vm2, %v400_v60, 0.0  ;;  %v1609_v59 = vadd.f32 %v2334_v61, %v1607_v39  ;;  %v1374_v5 = vsel %vm445_vm2, %v1326_v43, 0.0  ;;  %v1376_v53 = vsel %vm445_vm2, %v1330_v50, 0.0 }
  0x8f   : > { %v460_v21 = vadd.f32 %v459_v28, %v458_v30  ;;  %v1408_v23 = vrot.slane %v2287_v35, %v2065_v6  ;;  %v1373_v29 = vadd.f32 %v1372_v63, %v1371_v46  ;;  %v412_v45 = vrot.slane %v2636_v19, %v2065_v6 }
  0x90   : > { %v463_v22 = vsel %vm445_vm2, %v404_v48, 0.0  ;;  %v1412_v26 = vrot.slane %v2287_v35, %v2069_v8  ;;  %v1473_v61 = vsel %vm445_vm2, %v1396_v42, 0.0  ;;  %v1474_v18 = vsel %vm445_vm2, %v1400_v57, 0.0 }
  0x91   : > { %v462_v27 = vadd.f32 %v461_v34, %v460_v21  ;;  %v1476_v55 = vsel %vm445_vm2, %v1404_v44, 0.0  ;;  %v1375_v20 = vadd.f32 %v1374_v5, %v1373_v29  ;;  %v416_v0 = vrot.slane %v2636_v19, %v2069_v8  ;;  %v2874_v34 = vld [vmem:[#allocation4_spill] sm:$0xff]  ;;  %v2875_v21 = vld [vmem:[#allocation5_spill] sm:$0xff] }
  0x92   : > { %v465_v41 = vsel %vm445_vm2, %v408_v24, 0.0  ;;  %v1475_v33 = vadd.f32 %v1474_v18, %v1473_v61  ;;  %v1416_v36 = vrot.slane %v2287_v35, %v2079_v14  ;;  %v1478_v11 = vsel %vm445_vm2, %v1408_v23, 0.0  ;;  %v2876_v18 = vld [vmem:[#allocation6_spill] sm:$0xff] }
  0x93   : > { %v464_v9 = vadd.f32 %v463_v22, %v462_v27  ;;  %v1611_v54 = vadd.f32 %v2337_v62, %v1609_v59  ;;  %v1377_v10 = vadd.f32 %v1376_v53, %v1375_v20  ;;  %v420_v52 = vrot.slane %v2636_v19, %v2079_v14  ;;  %v2877_v20 = vld [vmem:[#allocation2_spill] sm:$0xff] }
  0x94   : > { %v467_v25 = vsel %vm445_vm2, %v412_v45, 0.0  ;;  %v1477_v39 = vadd.f32 %v1476_v55, %v1475_v33  ;;  %v1420_v56 = vrot.slane %v2287_v35, %v2081_v15  ;;  %v1424_v38 = vrot.slane %v2287_v35, %v2087_v17 }
  0x95   : > { %v466_v12 = vadd.f32 %v465_v41, %v464_v9  ;;  %v1480_v31 = vsel %vm445_vm2, %v1412_v26, 0.0  ;;  %1378 = vadd.xlane.f32.xlu1 %v1377_v10  ;;  %v424_v62 = vrot.slane %v2636_v19, %v2081_v15  ;;  %v469_v47 = vsel %vm445_vm2, %v416_v0, 0.0  ;;  %v2878_v0 = vld [vmem:[#allocation3_spill] sm:$0xff] }
  0x96   : > { %v1428_v43 = vrot.slane %v2375_v32, %v2056_v2  ;;  %v1479_v50 = vadd.f32 %v1478_v11, %v1477_v39  ;;  %v1432_v60 = vrot.slane %v2375_v32, %v2058_v3  ;;  %v1482_v51 = vsel %vm445_vm2, %v1416_v36, 0.0  ;;  %v2879_v10 = vld [vmem:[#allocation7_spill] sm:$0xff] }
  0x97   : > { %v468_v58 = vadd.f32 %v467_v25, %v466_v12  ;;  %v1613_v35 = vadd.f32 %v2343_v16, %v1611_v54  ;;  %v428_v63 = vrot.slane %v2636_v19, %v2087_v17  ;;  %v471_v48 = vsel %vm445_vm2, %v420_v52, 0.0 }
  0x98   : > { %v1436_v28 = vrot.slane %v2375_v32, %v2060_v4  ;;  %v1481_v30 = vadd.f32 %v1480_v31, %v1479_v50  ;;  %v1440_v57 = vrot.slane %v2375_v32, %v2065_v6  ;;  %v1484_v44 = vsel %vm445_vm2, %v1420_v56, 0.0 }
  0x99   : > { %v470_v42 = vadd.f32 %v469_v47, %v468_v58  ;;  %v1615_v46 = vadd.f32 %v2346_v37, %v1613_v35  ;;  %v473_v24 = vsel %vm445_vm2, %v424_v62, 0.0  ;;  %v1654_v19 = vrot.slane %v2874_v34, %v2056_v2 }
  0x9a   : > { %v1483_v16 = vadd.f32 %v1482_v51, %v1481_v30  ;;  %v1658_v59 = vrot.slane %v2874_v34, %v2058_v3  ;;  %v1486_v53 = vsel %vm445_vm2, %v1424_v38, 0.0  ;;  %v1662_v29 = vrot.slane %v2874_v34, %v2060_v4 }
  0x9b   : > { %v472_v5 = vadd.f32 %v471_v48, %v470_v42  ;;  %v1617_v23 = vadd.f32 %v2875_v21, %v1615_v46  ;;  %v475_v45 = vsel %vm445_vm2, %v428_v63, 0.0  ;;  %v1488_v22 = vsel %vm445_vm2, %v1428_v43, 0.0 }
  0x9c   : > { %v1485_v37 = vadd.f32 %v1484_v44, %v1483_v16  ;;  %v1666_v26 = vrot.slane %v2874_v34, %v2065_v6  ;;  %v1490_v61 = vsel %vm445_vm2, %v1432_v60, 0.0  ;;  %v1645_v41 = vmul.f32 %v2878_v0, %v2877_v20 }
  0x9d   : > { %v474_v27 = vadd.f32 %v473_v24, %v472_v5  ;;  %v1619_v55 = vadd.f32 %v2876_v18, %v1617_v23  ;;  %v1670_v9 = vrot.slane %v2874_v34, %v2069_v8  ;;  %v1731_v36 = vsel %vm445_vm2, %v1654_v19, 0.0 }
  0x9e   : > { %v1487_v33 = vadd.f32 %v1486_v53, %v1485_v37  ;;  %v1732_v11 = vsel %vm445_vm2, %v1658_v59, 0.0  ;;  %v1734_v39 = vsel %vm445_vm2, %v1662_v29, 0.0  ;;  %v2880_v56 = vrot.slane %v2261_v13, %v2079_v14 }
  0x9f   : > { %v476_v54 = vadd.f32 %v475_v45, %v474_v27  ;;  %v1621_v52 = vadd.f32 %v2879_v10, %v1619_v55  ;;  %v1733_v25 = vadd.f32 %v1732_v11, %v1731_v36  ;;  %v1674_v31 = vrot.slane %v2874_v34, %v2079_v14 }
  0xa0   : > { %v1489_v12 = vadd.f32 %v1488_v22, %v1487_v33  ;;  %v1626_v38 = vsel %vm445_vm2, %v2880_v56, 0.0  ;;  %v1736_v62 = vsel %vm445_vm2, %v1666_v26, 0.0  ;;  %v1444_v47 = vrot.slane %v2375_v32, %v2069_v8 }
  0xa1   : > { %477 = vadd.xlane.f32.xlu0 %v476_v54  ;;  %v1492_v43 = vsel %vm445_vm2, %v1436_v28, 0.0  ;;  %v1623_v50 = vadd.f32 %v2645_v1, %v1621_v52  ;;  %v1735_v58 = vadd.f32 %v1734_v39, %v1733_v25  ;;  %v1448_v60 = vrot.slane %v2375_v32, %v2079_v14 }
  0xa2   : > { %v1491_v51 = vadd.f32 %v1490_v61, %v1489_v12  ;;  %v1678_v35 = vrot.slane %v2874_v34, %v2081_v15  ;;  %v1738_v63 = vsel %vm445_vm2, %v1670_v9, 0.0  ;;  %v1494_v48 = vsel %vm445_vm2, %v1440_v57, 0.0 }
  0xa3   : > { %v1625_v30 = vadd.f32 %v2652_v49, %v1623_v50  ;;  %v1648_v42 = vsel %vm333_vm6, %v1645_v41, 0.0  ;;  %v1737_v28 = vadd.f32 %v1736_v62, %v1735_v58  ;;  %v2881_v1 = vrot.slane %v2261_v13, %v2081_v15 }
  0xa4   : > { %v1493_v44 = vadd.f32 %v1492_v43, %v1491_v51  ;;  %v1682_v24 = vrot.slane %v2874_v34, %v2087_v17  ;;  %v1740_v16 = vsel %vm445_vm2, %v1674_v31, 0.0  ;;  %v1452_v49 = vrot.slane %v2375_v32, %v2081_v15 }
  0xa5   : > { %v1628_v46 = vsel %vm445_vm2, %v2881_v1, 0.0  ;;  %1248 = vadd.xlane.f32.xlu0 %v2629_v40  ;;  %v1496_v7 = vsel %vm445_vm2, %v1444_v47, 0.0  ;;  %v1627_v57 = vadd.f32 %v1626_v38, %v1625_v30  ;;  %v1739_v19 = vadd.f32 %v1738_v63, %v1737_v28 }
  0xa6   : > { %v1495_v59 = vadd.f32 %v1494_v48, %v1493_v44  ;;  %v2882_v5 = vrot.slane %v2261_v13, %v2087_v17  ;;  %v1686_v21 = vrot.slane %v1648_v42, %v2056_v2  ;;  %v1742_v34 = vsel %vm445_vm2, %v1678_v35, 0.0 }
  0xa7   : > { %v1456_v40 = vrot.slane %v2375_v32, %v2087_v17  ;;  %v1498_v23 = vsel %vm445_vm2, %v1448_v60, 0.0  ;;  %v1629_v29 = vadd.f32 %v1628_v46, %v1627_v57  ;;  %v1741_v45 = vadd.f32 %v1740_v16, %v1739_v19 }
  0xa8   : > { %v1630_v53 = vsel %vm445_vm2, %v2882_v5, 0.0  ;;  %v1497_v37 = vadd.f32 %v1496_v7, %v1495_v59  ;;  %v1690_v22 = vrot.slane %v1648_v42, %v2058_v3  ;;  %v1744_v26 = vsel %vm445_vm2, %v1682_v24, 0.0 }
  0xa9   : > { %v1500_v13 = vsel %vm445_vm2, %v1452_v49, 0.0  ;;  %v1631_v27 = vadd.f32 %v1630_v53, %v1629_v29  ;;  %v1743_v61 = vadd.f32 %v1742_v34, %v1741_v45  ;;  %v1694_v2 = vrot.slane %v1648_v42, %v2060_v4 }
  0xaa   : > { %v1499_v18 = vadd.f32 %v1498_v23, %v1497_v37  ;;  %v1746_v55 = vsel %vm445_vm2, %v1686_v21, 0.0  ;;  %v1502_v32 = vsel %vm445_vm2, %v1456_v40, 0.0  ;;  %v1698_v41 = vrot.slane %v1648_v42, %v2065_v6 }
  0xab   : > { %1632 = vadd.xlane.f32.xlu1 %v1631_v27  ;;  %v1745_v20 = vadd.f32 %v1744_v26, %v1743_v61  ;;  %v1748_v3 = vsel %vm445_vm2, %v1690_v22, 0.0  ;;  %v1702_v36 = vrot.slane %v1648_v42, %v2069_v8  ;;  %v1750_v11 = vsel %vm445_vm2, %v1694_v2, 0.0 }
  0xac   : > { %v1501_v0 = vadd.f32 %v1500_v13, %v1499_v18  ;;  %v1706_v4 = vrot.slane %v1648_v42, %v2079_v14  ;;  %v1752_v10 = vsel %vm445_vm2, %v1698_v41, 0.0  ;;  %v1710_v25 = vrot.slane %v1648_v42, %v2081_v15 }
  0xad   : > { %v1747_v33 = vadd.f32 %v1746_v55, %v1745_v20  ;;  %v1754_v6 = vsel %vm445_vm2, %v1702_v36, 0.0  ;;  %v1714_v12 = vrot.slane %v1648_v42, %v2087_v17  ;;  %v2883_v15 = vmov 0.0  }
  0xae   : > { %v1503_v9 = vadd.f32 %v1502_v32, %v1501_v0  ;;  %v1756_v8 = vsel %vm445_vm2, %v1706_v4, 0.0  ;;  %v1758_v38 = vsel %vm445_vm2, %v1710_v25, 0.0  ;;  %270 = vst.msk [vmem:[%s2805_s26] sm:$0x1] %vm269_vm9, %v2883_v15 }
  0xaf   : > { %v1749_v54 = vadd.f32 %v1748_v3, %v1747_v33  ;;  %v1760_v62 = vsel %vm445_vm2, %v1714_v12, 0.0  ;;  %268 = vst.msk [vmem:[%s2814_s30] sm:$0xf] %vm267_vm10, %v2883_v15 }
  0xb0   : > { %1504 = vadd.xlane.f32.xlu0 %v1503_v9 }
  0xb1   : > { %v1751_v52 = vadd.f32 %v1750_v11, %v1749_v54 }
  0xb3   : > { %v1753_v39 = vadd.f32 %v1752_v10, %v1751_v52 }
  0xb5   : > { %v1755_v56 = vadd.f32 %v1754_v6, %v1753_v39 }
  0xb7   : > { %v1757_v31 = vadd.f32 %v1756_v8, %v1755_v56 }
  0xb9   : > { %v1759_v14 = vadd.f32 %v1758_v38, %v1757_v31 }
  0xbb   : > { %v1761_v47 = vadd.f32 %v1760_v62, %v1759_v14 }
  0xbd   : > { %1762 = vadd.xlane.f32.xlu0 %v1761_v47 }
  0xc4   : > { %v864_v17 = vpop.xlane.xlu1 %863 }
  0xc5   : > { %v865_v63 = vrot.slane %v864_v17, 4 }
  0xc7   : > { %v866_v1 = vadd.f32 %v865_v63, %v864_v17 }
  0xc9   : > { %v867_v59 = vrot.slane %v866_v1, 2 }
  0xcb   : > { %v868_v26 = vadd.f32 %v867_v59, %v866_v1  ;;  %v362_v1 = vld [vmem:[%s2805_s26] sm:$0x1] }
  0xcd   : > { %v869_v0 = vrot.slane %v868_v26, 1 }
  0xcf   : > { %v870_v6 = vadd.f32 %v869_v0, %v868_v26 }
  0xf4   : > { %v609_v50 = vpop.xlane.xlu0 %608 }
  0xf5   : > { %v610_v60 = vrot.slane %v609_v50, 4 }
  0xf7   : > { %v611_v42 = vadd.f32 %v610_v60, %v609_v50 }
  0xf9   : > { %v612_v16 = vrot.slane %v611_v42, 2 }
  0xfb   : > { %v613_v23 = vadd.f32 %v612_v16, %v611_v42 }
  0xfc   : > { %v735_v43 = vpop.xlane.xlu1 %734 }
  0xfd   : > { %v736_v35 = vrot.slane %v735_v43, 4  ;;  %v614_v18 = vrot.slane %v613_v23, 1 }
  0xff   : > { %v737_v44 = vadd.f32 %v736_v35, %v735_v43  ;;  %v615_v54 = vadd.f32 %v614_v18, %v613_v23 }
 0x101   : > { %v738_v57 = vrot.slane %v737_v44, 2 }
 0x103   : > { %v739_v37 = vadd.f32 %v738_v57, %v737_v44  ;;  %v878_v57 = vld [vmem:[%s2814_s30 + $0x1] sm:$0x1] }
 0x105   : > { %v740_v20 = vrot.slane %v739_v37, 1 }
 0x107   : > { %v741_v10 = vadd.f32 %v740_v20, %v739_v37  ;;  %v1646_v20 = vld [vmem:[%s2814_s30 + $0x3] sm:$0x1] }
 0x108   : > { %v995_v51 = vpop.xlane.xlu0 %994 }
 0x109   : > { %v996_v48 = vrot.slane %v995_v51, 4 }
 0x10b   : > { %v997_v24 = vadd.f32 %v996_v48, %v995_v51 }
 0x10d   : > { %v998_v53 = vrot.slane %v997_v24, 2 }
 0x10f   : > { %v999_v61 = vadd.f32 %v998_v53, %v997_v24 }
 0x111   : > { %v1000_v9 = vrot.slane %v999_v61, 1 }
 0x113   : > { %v1001_v8 = vadd.f32 %v1000_v9, %v999_v61 }
 0x115   : > { %v1121_v58 = vpop.xlane.xlu1 %1120 }
 0x116   : > { %v1122_v28 = vrot.slane %v1121_v58, 4 }
 0x118   : > { %v1123_v49 = vadd.f32 %v1122_v28, %v1121_v58 }
 0x11a   : > { %v1124_v34 = vrot.slane %v1123_v49, 2 }
 0x11c   : > { %v1125_v2 = vadd.f32 %v1124_v34, %v1123_v49 }
 0x11e   : > { %v1126_v4 = vrot.slane %v1125_v2, 1 }
 0x120   : > { %v1127_v62 = vadd.f32 %v1126_v4, %v1125_v2 }
 0x122   : > { %v1379_v30 = vpop.xlane.xlu1 %1378 }
 0x123   : > { %v1380_v46 = vrot.slane %v1379_v30, 4 }
 0x125   : > { %v1381_v5 = vadd.f32 %v1380_v46, %v1379_v30  ;;  %v492_v46 = vld [vmem:[%s2814_s30] sm:$0x1] }
 0x127   : > { %v1382_v22 = vrot.slane %v1381_v5, 2 }
 0x129   : > { %v1383_v41 = vadd.f32 %v1382_v22, %v1381_v5  ;;  %v1262_v5 = vld [vmem:[%s2814_s30 + $0x2] sm:$0x1] }
 0x12b   : > { %v1384_v39 = vrot.slane %v1383_v41, 1 }
 0x12d   : > { %v1385_v15 = vadd.f32 %v1384_v39, %v1383_v41 }
 0x12e   : > { %v478_v7 = vpop.xlane.xlu0 %477 }
 0x12f   : > { %v479_v19 = vrot.slane %v478_v7, 4 }
 0x131   : > { %v480_v21 = vadd.f32 %v479_v19, %v478_v7 }
 0x132   : > { %v1249_v40 = vpop.xlane.xlu0 %1248 }
 0x133   : > { %v481_v29 = vrot.slane %v480_v21, 2  ;;  %v1250_v45 = vrot.slane %v1249_v40, 4 }
 0x135   : > { %v1251_v13 = vadd.f32 %v1250_v45, %v1249_v40  ;;  %v482_v27 = vadd.f32 %v481_v29, %v480_v21 }
 0x137   : > { %v1252_v55 = vrot.slane %v1251_v13, 2  ;;  %v483_v32 = vrot.slane %v482_v27, 1 }
 0x138   : > { %v1633_v3 = vpop.xlane.xlu1 %1632 }
 0x139   : > { %v484_v33 = vadd.f32 %v483_v32, %v482_v27  ;;  %v1253_v36 = vadd.f32 %v1252_v55, %v1251_v13  ;;  %v1634_v11 = vrot.slane %v1633_v3, 4 }
 0x13b   : > { %1910 = vpush %v484_v33  ;;  %v1254_v52 = vrot.slane %v1253_v36, 1  ;;  %v1635_v25 = vadd.f32 %v1634_v11, %v1633_v3 }
 0x13c   : > { %1912 = vpush %v615_v54 }
 0x13d   : > { %v1505_v12 = vpop.xlane.xlu0 %1504  ;;  %1914 = vpush %v741_v10  ;;  %v1255_v56 = vadd.f32 %v1254_v52, %v1253_v36  ;;  %v1636_v38 = vrot.slane %v1635_v25, 2 }
 0x13e   : > { %v1506_v31 = vrot.slane %v1505_v12, 4  ;;  %1916 = vpush %v870_v6 }
 0x13f   : > { %1918 = vpush %v1001_v8  ;;  %v1637_v14 = vadd.f32 %v1636_v38, %v1635_v25 }
 0x140   : > { %v1507_v47 = vadd.f32 %v1506_v31, %v1505_v12  ;;  %1920 = vpush %v1127_v62 }
 0x141   : > { %1922 = vpush %v1255_v56  ;;  %v1638_v43 = vrot.slane %v1637_v14, 1 }
 0x142   : > { %v1508_v17 = vrot.slane %v1507_v47, 2  ;;  %1924 = vpush %v1385_v15 }
 0x143   : > { %v1639_v60 = vadd.f32 %v1638_v43, %v1637_v14 }
 0x144   : > { %v1509_v50 = vadd.f32 %v1508_v17, %v1507_v47 }
 0x146   : > { %v1510_v58 = vrot.slane %v1509_v50, 1 }
 0x148   : > { %v1511_v51 = vadd.f32 %v1510_v58, %v1509_v50 }
 0x14a   : > { %v1763_v35 = vpop.xlane.xlu0 %1762  ;;  %1926 = vpush %v1511_v51 }
 0x14b   : > { %v1764_v63 = vrot.slane %v1763_v35, 4  ;;  %1928 = vpush %v1639_v60 }
 0x14d   : > { %v1765_v48 = vadd.f32 %v1764_v63, %v1763_v35 }
 0x14f   : > { %v1766_v30 = vrot.slane %v1765_v48, 2 }
 0x151   : > { %v1767_v42 = vadd.f32 %v1766_v30, %v1765_v48 }
 0x153   : > { %v1768_v28 = vrot.slane %v1767_v42, 1 }
 0x155   : > { %v1769_v44 = vadd.f32 %v1768_v28, %v1767_v42 }
 0x157   : > { %1930 = vpush %v1769_v44 }
 0x16c   : > { %s1911_s4 = spop %1910 }
 0x16d   : > { %v486_v24 = vstv %s1911_s4  ;;  %s1913_s5 = spop %1912 }
 0x16e   : > { %v487_v16 = vadd.f32 %v486_v24, %v362_v1  ;;  %v617_v49 = vstv %s1913_s5  ;;  %s1915_s6 = spop %1914 }
 0x16f   : > { %v618_v7 = vadd.f32 %v617_v49, %v492_v46  ;;  %s2820_s7 = spop %1916  ;;  %v743_v40 = vstv %s1915_s6 }
 0x170   : > { %489 = vst.msk [vmem:[%s2805_s26] sm:$0x1] %vm269_vm9, %v487_v16  ;;  %s1919_s8 = spop %1918  ;;  %v872_v61 = vstv %s2820_s7 }
 0x171   : > { %619 = vst.msk [vmem:[%s2814_s30] sm:$0x1] %vm269_vm9, %v618_v7  ;;  %v1003_v19 = vstv %s1919_s8  ;;  %s1921_s9 = spop %1920 }
 0x172   : > { %v1004_v59 = vadd.f32 %v1003_v19, %v878_v57  ;;  %s1923_s10 = spop %1922  ;;  %v1129_v45 = vstv %s1921_s9 }
 0x173   : > { %s1925_s11 = spop %1924  ;;  %v1257_v55 = vstv %s1923_s10 }
 0x174   : > { %1005 = vst.msk [vmem:[%s2814_s30 + $0x1] sm:$0x1] %vm269_vm9, %v1004_v59  ;;  %v1387_v53 = vstv %s1925_s11 }
 0x175   : > { %v1388_v21 = vadd.f32 %v1387_v53, %v1262_v5 }
 0x177   : > { %1389 = vst.msk [vmem:[%s2814_s30 + $0x2] sm:$0x1] %vm269_vm9, %v1388_v21 }
 0x178   : > { %v620_v34 = vld [vmem:[%s2814_s30] sm:$0x1] }
 0x179   : > { %v744_v23 = vadd.f32 %v743_v40, %v620_v34 }
 0x17b   : > { %746 = vst.msk [vmem:[%s2814_s30] sm:$0x1] %vm745_vm11, %v744_v23  ;;  %v1006_v29 = vld [vmem:[%s2814_s30 + $0x1] sm:$0x1]  ;;  %s1927_s12 = spop %1926 }
 0x17c   : > { %v1130_v37 = vadd.f32 %v1129_v45, %v1006_v29  ;;  %v1513_v26 = vstv %s1927_s12  ;;  %s1929_s16 = spop %1928 }
 0x17d   : > { %v1641_v41 = vstv %s1929_s16 }
 0x17e   : > { %1131 = vst.msk [vmem:[%s2814_s30 + $0x1] sm:$0x1] %vm745_vm11, %v1130_v37  ;;  %v1390_v22 = vld [vmem:[%s2814_s30 + $0x2] sm:$0x1] }
 0x17f   : > { %v1514_v13 = vadd.f32 %v1513_v26, %v1390_v22 }
 0x181   : > { %1515 = vst.msk [vmem:[%s2814_s30 + $0x2] sm:$0x1] %vm745_vm11, %v1514_v13 }
 0x182   : > { %v747_v27 = vld [vmem:[%s2814_s30] sm:$0x1] }
 0x183   : > { %v873_v18 = vadd.f32 %v872_v61, %v747_v27 }
 0x185   : > { %875 = vst.msk [vmem:[%s2814_s30] sm:$0x1] %vm874_vm12, %v873_v18  ;;  %v1132_v2 = vld [vmem:[%s2814_s30 + $0x1] sm:$0x1] }
 0x186   : > { %v1258_v32 = vadd.f32 %v1257_v55, %v1132_v2 }
 0x188   : > { %1259 = vst.msk [vmem:[%s2814_s30 + $0x1] sm:$0x1] %vm874_vm12, %v1258_v32  ;;  %v1516_v0 = vld [vmem:[%s2814_s30 + $0x2] sm:$0x1]  ;;  %s1931_s17 = spop %1930 }
 0x189   : > { %v1642_v3 = vadd.f32 %v1641_v41, %v1516_v0  ;;  %v1771_v33 = vstv %s1931_s17 }
 0x18a   : > { %v1772_v9 = vadd.f32 %v1771_v33, %v1646_v20 }
 0x18b   : > { %1643 = vst.msk [vmem:[%s2814_s30 + $0x2] sm:$0x1] %vm874_vm12, %v1642_v3 }
 0x18c   : > { %1773 = vst.msk [vmem:[%s2814_s30 + $0x3] sm:$0x1] %vm269_vm9, %v1772_v9 }
 0x18d PF: > { %s14_s14 = sadd.s32 1, %s2008_s14   ;;  %s2884_s12 = smov %s2004_s13 }
 0x18e   : > { %p11_p5 = scmp.ge.s32.totalorder %s14_s14, 4   ;;  %s2885_s13 = smov %s2887_s15 }
 0x190   :  { %13 = sbr.rel (!%p11_p5) target bundleno = 2 (0x2), region = 80 }

</bundles_post_ra>
